<compile_context>
chip_gen: v5e
topology: v5e:2x2
jax: 0.10.0
libtpu: 0.0.40
codegen_flags: <defaults>
</compile_context>

<pallas_src>
import jax
import jax.numpy as jnp
from jax.experimental import pallas as pl
from jax.experimental.pallas import tpu as pltpu

INPUT_SIZE = 784
HIDDEN_SIZE = 500
NUM_CLASSES = 10

# Lane/sublane-aligned padded dims (zero-padded once; zeros are no-ops in the math).
IN_PAD = 896    # 784 -> 7*128
HID_PAD = 512   # 500 -> 4*128
OUT_PAD = 128   # 10  -> 1*128


def _round_up(n, m):
    return (n + m - 1) // m * m


def mlp_kernel(x_ref, w1_ref, b1_ref, w2_ref, b2_ref, o_ref):
    # fc1 on the MXU: bf16 x bf16 inputs, f32 accumulation.
    h = jnp.dot(x_ref[...], w1_ref[...], preferred_element_type=jnp.float32)
    # bias add (row 0 of the 8-replicated bias tile) + ReLU, in f32 on the VPU.
    h = jnp.maximum(h + b1_ref[0:1, :], 0.0)
    # fc2: single bf16 cast of the activations, f32 accumulation.
    out = jnp.dot(h.astype(jnp.bfloat16), w2_ref[...],
                  preferred_element_type=jnp.float32)
    o_ref[...] = (out + b2_ref[0:1, :]).astype(o_ref.dtype)


def feed_forward(x, w1_p, b1_p, w2_p, b2_p, *, tile_b=256):
    """x: [B, 784] f32 -> [B, 10] f32, matching fc1 -> ReLU -> fc2."""
    B = x.shape[0]
    tb = min(tile_b, _round_up(max(B, 1), 8))   # batch tile, multiple of 8 sublanes
    Bp = _round_up(B, tb)

    # Pad batch/feature dims and cast activations to bf16 (weights already bf16).
    xp = jnp.pad(x.astype(jnp.bfloat16),
                 ((0, Bp - B), (0, IN_PAD - INPUT_SIZE)))

    flops = 2 * Bp * (IN_PAD * HID_PAD + HID_PAD * OUT_PAD)
    bytes_accessed = (xp.size * 2 + w1_p.size * 2 + w2_p.size * 2
                      + b1_p.size * 4 + b2_p.size * 4 + Bp * OUT_PAD * 4)

    out_p = pl.pallas_call(
        mlp_kernel,
        out_shape=jax.ShapeDtypeStruct((Bp, OUT_PAD), jnp.float32),
        grid_spec=pltpu.PrefetchScalarGridSpec(
            num_scalar_prefetch=0,
            grid=(Bp // tb,),
            in_specs=[
                # activations: tiled over batch, pipelined HBM<->VMEM
                pl.BlockSpec((tb, IN_PAD), lambda i: (i, 0)),
                # weights/biases: constant block index -> VMEM-resident across steps
                pl.BlockSpec((IN_PAD, HID_PAD), lambda i: (0, 0)),
                pl.BlockSpec((8, HID_PAD), lambda i: (0, 0)),
                pl.BlockSpec((HID_PAD, OUT_PAD), lambda i: (0, 0)),
                pl.BlockSpec((8, OUT_PAD), lambda i: (0, 0)),
            ],
            out_specs=pl.BlockSpec((tb, OUT_PAD), lambda i: (i, 0)),
        ),
        compiler_params=pltpu.CompilerParams(
            dimension_semantics=("parallel",)),   # batch tiles split across TCs on v7x
        cost_estimate=pl.CostEstimate(flops=flops, transcendentals=0,
                                      bytes_accessed=bytes_accessed),
    )(xp, w1_p, b1_p, w2_p, b2_p)

    # Strip batch/class padding outside the kernel.
    return out_p[:B, :NUM_CLASSES]


def init_params(key):
    """Deterministic init mimicking nn.Linear default (uniform +/- 1/sqrt(fan_in)).

    Returns (float32 reference params, padded/bf16 kernel params)."""
    k1, k2, k3, k4 = jax.random.split(key, 4)
    bound1 = 1.0 / jnp.sqrt(INPUT_SIZE)
    bound2 = 1.0 / jnp.sqrt(HIDDEN_SIZE)
    # weights stored already transposed: [in, out]
    w1 = jax.random.uniform(k1, (INPUT_SIZE, HIDDEN_SIZE), jnp.float32, -bound1, bound1)
    b1 = jax.random.uniform(k2, (HIDDEN_SIZE,), jnp.float32, -bound1, bound1)
    w2 = jax.random.uniform(k3, (HIDDEN_SIZE, NUM_CLASSES), jnp.float32, -bound2, bound2)
    b2 = jax.random.uniform(k4, (NUM_CLASSES,), jnp.float32, -bound2, bound2)

    # Zero-pad to aligned shapes; weights to bf16 (halves HBM traffic), biases
    # kept f32 and replicated to 8 sublanes.
    w1_p = jnp.pad(w1, ((0, IN_PAD - INPUT_SIZE),
                        (0, HID_PAD - HIDDEN_SIZE))).astype(jnp.bfloat16)
    w2_p = jnp.pad(w2, ((0, HID_PAD - HIDDEN_SIZE),
                        (0, OUT_PAD - NUM_CLASSES))).astype(jnp.bfloat16)
    b1_p = jnp.tile(jnp.pad(b1, (0, HID_PAD - HIDDEN_SIZE))[None, :], (8, 1))
    b2_p = jnp.tile(jnp.pad(b2, (0, OUT_PAD - NUM_CLASSES))[None, :], (8, 1))
    return (w1, b1, w2, b2), (w1_p, b1_p, w2_p, b2_p)


def _bf16_matched_ref(x, w1_p, b1, w2_p, b2):
    """Plain-JAX reference using the same bf16-quantized operands as the kernel."""
    xq = x.astype(jnp.bfloat16).astype(jnp.float32)
    w1q = w1_p[:INPUT_SIZE, :HIDDEN_SIZE].astype(jnp.float32)
    w2q = w2_p[:HIDDEN_SIZE, :NUM_CLASSES].astype(jnp.float32)
    h = jnp.maximum(xq @ w1q + b1, 0.0)
    h = h.astype(jnp.bfloat16).astype(jnp.float32)
    return h @ w2q + b2


if __name__ == "__main__":
    key = jax.random.PRNGKey(0)
    kx, kp = jax.random.split(key)
    (w1, b1, w2, b2), (w1_p, b1_p, w2_p, b2_p) = init_params(kp)

    fwd = jax.jit(feed_forward)

    # Small batch (single grid step).
    batch = 8
    x = jax.random.normal(kx, (batch, INPUT_SIZE), jnp.float32)
    out = jax.block_until_ready(fwd(x, w1_p, b1_p, w2_p, b2_p))
    assert out.shape == (batch, NUM_CLASSES)
    ref = _bf16_matched_ref(x, w1_p, b1, w2_p, b2)
    assert jnp.allclose(out, ref, atol=1e-2, rtol=1e-2)

    # Non-multiple-of-tile batch (exercises batch tiling + padding path).
    batch2 = 300
    x2 = jax.random.normal(jax.random.PRNGKey(1), (batch2, INPUT_SIZE), jnp.float32)
    out2 = jax.block_until_ready(fwd(x2, w1_p, b1_p, w2_p, b2_p))
    assert out2.shape == (batch2, NUM_CLASSES)
    ref2 = _bf16_matched_ref(x2, w1_p, b1, w2_p, b2)
    assert jnp.allclose(out2, ref2, atol=1e-2, rtol=1e-2)

    print("KERNEL_OK")
</pallas_src>

<mosaic_0001>
module attributes {stable_mosaic.version = 11 : i64} {
  func.func @mlp_kernel(%arg0: i32, %arg1: memref<8x896xbf16, #tpu.memory_space<vmem>>, %arg2: memref<896x512xbf16, #tpu.memory_space<vmem>>, %arg3: memref<8x512xf32, #tpu.memory_space<vmem>>, %arg4: memref<512x128xbf16, #tpu.memory_space<vmem>>, %arg5: memref<8x128xf32, #tpu.memory_space<vmem>>, %arg6: memref<8x128xf32, #tpu.memory_space<vmem>>) attributes {dimension_semantics = [#tpu.dimension_semantics<parallel>], iteration_bounds = array<i64: 1>, scalar_prefetch = 0 : i64, scratch_operands = 0 : i64, tpu.core_type = #tpu.core_type<tc>, window_params = [{transform_indices = @transform_0, window_bounds = array<i64: 8, 896>}, {pipeline_mode = #tpu.pipeline_mode<synchronous>, transform_indices = @transform_1, window_bounds = array<i64: 896, 512>}, {pipeline_mode = #tpu.pipeline_mode<synchronous>, transform_indices = @transform_2, window_bounds = array<i64: 8, 512>}, {pipeline_mode = #tpu.pipeline_mode<synchronous>, transform_indices = @transform_3, window_bounds = array<i64: 512, 128>}, {pipeline_mode = #tpu.pipeline_mode<synchronous>, transform_indices = @transform_4, window_bounds = array<i64: 8, 128>}, {transform_indices = @transform_5, window_bounds = array<i64: 8, 128>}]} {
    %c0 = arith.constant 0 : index
    %c0_0 = arith.constant 0 : index
    %0 = vector.load %arg1[%c0, %c0_0] : memref<8x896xbf16, #tpu.memory_space<vmem>>, vector<8x896xbf16>
    %c0_1 = arith.constant 0 : index
    %c0_2 = arith.constant 0 : index
    %1 = vector.load %arg2[%c0_1, %c0_2] : memref<896x512xbf16, #tpu.memory_space<vmem>>, vector<896x512xbf16>
    %cst = arith.constant dense<0.000000e+00> : vector<8x512xf32>
    %2 = tpu.matmul %0, %1, %cst {dimension_numbers = #tpu.dot_dimension_numbers<[1], [0], [0], [1], [0, 0, 1, 1], [], []>} : vector<8x896xbf16>, vector<896x512xbf16>, vector<8x512xf32> -> vector<8x512xf32>
    %c0_3 = arith.constant 0 : index
    %c0_4 = arith.constant 0 : index
    %3 = vector.load %arg3[%c0_3, %c0_4] : memref<8x512xf32, #tpu.memory_space<vmem>>, vector<1x512xf32>
    %4 = vector.broadcast %3 : vector<1x512xf32> to vector<8x512xf32>
    %5 = arith.addf %2, %4 : vector<8x512xf32>
    %cst_5 = arith.constant 0.000000e+00 : f32
    %6 = vector.broadcast %cst_5 : f32 to vector<8x512xf32>
    %7 = arith.maximumf %5, %6 : vector<8x512xf32>
    %8 = arith.truncf %7 : vector<8x512xf32> to vector<8x512xbf16>
    %c0_6 = arith.constant 0 : index
    %c0_7 = arith.constant 0 : index
    %9 = vector.load %arg4[%c0_6, %c0_7] : memref<512x128xbf16, #tpu.memory_space<vmem>>, vector<512x128xbf16>
    %cst_8 = arith.constant dense<0.000000e+00> : vector<8x128xf32>
    %10 = tpu.matmul %8, %9, %cst_8 {dimension_numbers = #tpu.dot_dimension_numbers<[1], [0], [0], [1], [0, 0, 1, 1], [], []>} : vector<8x512xbf16>, vector<512x128xbf16>, vector<8x128xf32> -> vector<8x128xf32>
    %c0_9 = arith.constant 0 : index
    %c0_10 = arith.constant 0 : index
    %11 = vector.load %arg5[%c0_9, %c0_10] : memref<8x128xf32, #tpu.memory_space<vmem>>, vector<1x128xf32>
    %12 = vector.broadcast %11 : vector<1x128xf32> to vector<8x128xf32>
    %13 = arith.addf %10, %12 : vector<8x128xf32>
    %c0_11 = arith.constant 0 : index
    %c0_12 = arith.constant 0 : index
    %14 = vector.load %arg6[%c0_11, %c0_12] : memref<8x128xf32, #tpu.memory_space<vmem>>, vector<8x128xf32>
    tpu.vector_store %arg6[%c0_11, %c0_12], %13 {strides = array<i32>} : memref<8x128xf32, #tpu.memory_space<vmem>>, vector<8x128xf32>,
    return
  }
  func.func @transform_0(%arg0: i32) -> (i32, i32) {
    %c0_i32 = arith.constant 0 : i32
    %c0_i32_0 = arith.constant 0 : i32
    return %arg0, %c0_i32 : i32, i32
  }
  func.func @transform_1(%arg0: i32) -> (i32, i32) {
    %c0_i32 = arith.constant 0 : i32
    %c0_i32_0 = arith.constant 0 : i32
    %c0_i32_1 = arith.constant 0 : i32
    return %c0_i32, %c0_i32_0 : i32, i32
  }
  func.func @transform_2(%arg0: i32) -> (i32, i32) {
    %c0_i32 = arith.constant 0 : i32
    %c0_i32_0 = arith.constant 0 : i32
    %c0_i32_1 = arith.constant 0 : i32
    return %c0_i32, %c0_i32_0 : i32, i32
  }
  func.func @transform_3(%arg0: i32) -> (i32, i32) {
    %c0_i32 = arith.constant 0 : i32
    %c0_i32_0 = arith.constant 0 : i32
    %c0_i32_1 = arith.constant 0 : i32
    return %c0_i32, %c0_i32_0 : i32, i32
  }
  func.func @transform_4(%arg0: i32) -> (i32, i32) {
    %c0_i32 = arith.constant 0 : i32
    %c0_i32_0 = arith.constant 0 : i32
    %c0_i32_1 = arith.constant 0 : i32
    return %c0_i32, %c0_i32_0 : i32, i32
  }
  func.func @transform_5(%arg0: i32) -> (i32, i32) {
    %c0_i32 = arith.constant 0 : i32
    %c0_i32_0 = arith.constant 0 : i32
    return %arg0, %c0_i32 : i32, i32
  }
}

</mosaic_0001>

<bundles_post_ra>
// kernel: feed_forward.1
= control target key start
LH: loop header
LB: loop body
LE: loop exit
PB: predicated region body
PF: predicated region fallthrough
CT: control target
= control target key end

     0   :  { %10 = vsyncpa [#allocation3], 0  ;;  %s3639_s0 = inlined_call_operand.vmem [shape: bf16[8,896], index: 0, kind: input, shape index: {}]   ;;  %s3640_s1 = inlined_call_operand.hbm [shape: bf16[896,512], index: 1, kind: input, shape index: {}]   ;;  %s3641_s2 = inlined_call_operand.vmem [shape: f32[8,512], index: 2, kind: input, shape index: {}]   ;;  %s3642_s3 = inlined_call_operand.hbm [shape: bf16[512,128], index: 3, kind: input, shape index: {}]   ;;  %s3643_s4 = inlined_call_operand.vmem [shape: f32[8,128], index: 4, kind: input, shape index: {}]   ;;  %s3644_s5 = inlined_call_operand.hbm [shape: f32[8,128], index: 5, kind: output, shape index: {}]  }
   0x1   :  { %11 = vsyncpa [#allocation6], 0 }
   0x2   :  { %12 = vsyncpa [#allocation4], 0  ;;  %s19_s20 = sshll.u32 %s3640_s1, 4  ;;  %s3503_s21 = smov [#allocation2]   ;;  %s20_s20 = int_to_ptr.hbm [resolvable:$true] %s19_s20 }
   0x3   :  { %s21_s22 = sshll.u32 %s3503_s21, 4  ;;  %s34_s25 = sshll.u32 %s3642_s3, 4  ;;  %s22_s22 = int_to_ptr.vmem [resolvable:$true] %s21_s22  ;;  %s35_s25 = int_to_ptr.hbm [resolvable:$true] %s34_s25 }
   0x4   :  { %s3504_s26 = smov 256   ;;  %s3505_s27 = smov 16  }
   0x5   :  { %27 = dma.hbm_to_vmem [thread:$0]  %s20_s20, 28672, %s22_s22, [#allocation3], %s3504_s26, %s3504_s26, %s3505_s27  }
   0x6   :  { %s3506_s28 = smov [#allocation5]   ;;  %s3507_s30 = smov 64  }
   0x7   :  { %s36_s29 = sshll.u32 %s3506_s28, 4  ;;  %s3508_s6 = smov 4   ;;  %s37_s29 = int_to_ptr.vmem [resolvable:$true] %s36_s29 }
   0x8   :  { %42 = dma.hbm_to_vmem [thread:$0]  %s35_s25, 4096, %s37_s29, [#allocation6], %s3507_s30, %s3507_s30, %s3508_s6  }
   0x9   :  { %3497 = dma.done.wait [#allocation3], 28672  }
   0xa   :  { %3498 = vsyncadd [#allocation3], 4294938624 }
   0xb   :  { %3499 = dma.done.wait [#allocation6], 4096  }
   0xc   :  { %3500 = vsyncadd [#allocation6], 4294963200  ;;  %v2251_v0 = vld [vmem:[#allocation2 + $0xe0] sm:$0xf]  ;;  %v3191_v1 = vld [vmem:[#allocation2 + $0xec] sm:$0xf0] }
   0xd   :  { %v2379_v2 = vld [vmem:[#allocation2 + $0x1e0] sm:$0xf]  ;;  %v2252_v3 = vor.u32 %v3191_v1, %v2251_v0  ;;  %v3223_v4 = vld [vmem:[#allocation2 + $0x1ec] sm:$0xf0]  ;;  %s3509_s15 = smov [#allocation7]   ;;  %s2126_s19 = sshll.u32 %s3644_s5, 4  ;;  %s2127_s19 = int_to_ptr.hbm [resolvable:$true] %s2126_s19 }
   0xe   :  { %v2507_v5 = vld [vmem:[#allocation2 + $0x2e0] sm:$0xf]  ;;  %v3255_v6 = vld [vmem:[#allocation2 + $0x2ec] sm:$0xf0]  ;;  %v2380_v7 = vor.u32 %v3223_v4, %v2379_v2  ;;  %s2124_s16 = sshll.u32 %s3509_s15, 4  ;;  %s2125_s16 = int_to_ptr.vmem [resolvable:$true] %s2124_s16 }
   0xf   :  { %v2508_v8 = vor.u32 %v3255_v6, %v2507_v5  ;;  %v2635_v9 = vld [vmem:[#allocation2 + $0x3e0] sm:$0xf]  ;;  %v3287_v10 = vld [vmem:[#allocation2 + $0x3ec] sm:$0xf0]  ;;  %1436 = vmatpush.bf16.msra.mxu0 %v2252_v3 }
  0x10   :  { %v2235_v11 = vld [vmem:[#allocation2 + $0xc0] sm:$0xf]  ;;  %v2636_v12 = vor.u32 %v3287_v10, %v2635_v9  ;;  %v3187_v13 = vld [vmem:[#allocation2 + $0xcc] sm:$0xf0]  ;;  %1449 = vmatpush.bf16.msra.mxu1 %v2380_v7 }
  0x11   :  { %v2363_v14 = vld [vmem:[#allocation2 + $0x1c0] sm:$0xf]  ;;  %v3219_v15 = vld [vmem:[#allocation2 + $0x1cc] sm:$0xf0]  ;;  %1462 = vmatpush.bf16.msra.mxu2 %v2508_v8  ;;  %v2236_v16 = vor.u32 %v3187_v13, %v2235_v11 }
  0x12   :  { %v2364_v17 = vor.u32 %v3219_v15, %v2363_v14  ;;  %v2491_v18 = vld [vmem:[#allocation2 + $0x2c0] sm:$0xf]  ;;  %v3251_v19 = vld [vmem:[#allocation2 + $0x2cc] sm:$0xf0]  ;;  %1475 = vmatpush.bf16.msra.mxu3 %v2636_v12 }
  0x13   :  { %v2619_v20 = vld [vmem:[#allocation2 + $0x3c0] sm:$0xf]  ;;  %v2492_v21 = vor.u32 %v3251_v19, %v2491_v18  ;;  %v3283_v22 = vld [vmem:[#allocation2 + $0x3cc] sm:$0xf0]  ;;  %1437 = vmatpush.bf16.msra.mxu0 %v2236_v16 }
  0x14   :  { %v2219_v23 = vld [vmem:[#allocation2 + $0xa0] sm:$0xf]  ;;  %v3183_v24 = vld [vmem:[#allocation2 + $0xac] sm:$0xf0]  ;;  %v2620_v25 = vor.u32 %v3283_v22, %v2619_v20  ;;  %1450 = vmatpush.bf16.msra.mxu1 %v2364_v17 }
  0x15   :  { %v2347_v26 = vld [vmem:[#allocation2 + $0x1a0] sm:$0xf]  ;;  %v3215_v27 = vld [vmem:[#allocation2 + $0x1ac] sm:$0xf0]  ;;  %v2220_v29 = vor.u32 %v3183_v24, %v2219_v23  ;;  %1463 = vmatpush.bf16.msra.mxu2 %v2492_v21 }
  0x16   :  { %v2475_v28 = vld [vmem:[#allocation2 + $0x2a0] sm:$0xf]  ;;  %v3247_v30 = vld [vmem:[#allocation2 + $0x2ac] sm:$0xf0]  ;;  %v2348_v33 = vor.u32 %v3215_v27, %v2347_v26  ;;  %1476 = vmatpush.bf16.msra.mxu3 %v2620_v25 }
  0x17   :  { %v2603_v31 = vld [vmem:[#allocation2 + $0x3a0] sm:$0xf]  ;;  %v3279_v32 = vld [vmem:[#allocation2 + $0x3ac] sm:$0xf0]  ;;  %v2476_v34 = vor.u32 %v3247_v30, %v2475_v28  ;;  %1438 = vmatpush.bf16.msra.mxu0 %v2220_v29 }
  0x18   :  { %v2203_v35 = vld [vmem:[#allocation2 + $0x80] sm:$0xf]  ;;  %v3179_v36 = vld [vmem:[#allocation2 + $0x8c] sm:$0xf0]  ;;  %v2604_v38 = vor.u32 %v3279_v32, %v2603_v31  ;;  %1451 = vmatpush.bf16.msra.mxu1 %v2348_v33 }
  0x19   :  { %v2331_v37 = vld [vmem:[#allocation2 + $0x180] sm:$0xf]  ;;  %v3211_v39 = vld [vmem:[#allocation2 + $0x18c] sm:$0xf0]  ;;  %v2204_v44 = vor.u32 %v3179_v36, %v2203_v35  ;;  %1464 = vmatpush.bf16.msra.mxu2 %v2476_v34 }
  0x1a   :  { %v2459_v40 = vld [vmem:[#allocation2 + $0x280] sm:$0xf]  ;;  %v3243_v41 = vld [vmem:[#allocation2 + $0x28c] sm:$0xf0]  ;;  %v2332_v45 = vor.u32 %v3211_v39, %v2331_v37  ;;  %1477 = vmatpush.bf16.msra.mxu3 %v2604_v38  ;;  %v3189_v37 = vld [vmem:[#allocation2 + $0xe4] sm:$0xf] }
  0x1b   :  { %v2587_v42 = vld [vmem:[#allocation2 + $0x380] sm:$0xf]  ;;  %v3275_v43 = vld [vmem:[#allocation2 + $0x38c] sm:$0xf0]  ;;  %v2460_v46 = vor.u32 %v3243_v41, %v2459_v40  ;;  %1439 = vmatpush.bf16.msra.mxu0 %v2204_v44  ;;  %v2253_v38 = vld [vmem:[#allocation2 + $0xf0] sm:$0xf0] }
  0x1c   :  { %v2187_v47 = vld [vmem:[#allocation2 + $0x60] sm:$0xf]  ;;  %v3175_v48 = vld [vmem:[#allocation2 + $0x6c] sm:$0xf0]  ;;  %v2588_v50 = vor.u32 %v3275_v43, %v2587_v42  ;;  %1452 = vmatpush.bf16.msra.mxu1 %v2332_v45 }
  0x1d   :  { %v2315_v49 = vld [vmem:[#allocation2 + $0x160] sm:$0xf]  ;;  %v3207_v51 = vld [vmem:[#allocation2 + $0x16c] sm:$0xf0]  ;;  %v2188_v56 = vor.u32 %v3175_v48, %v2187_v47  ;;  %1465 = vmatpush.bf16.msra.mxu2 %v2460_v46  ;;  %v2256_v46 = vor.u32 %v3189_v37, %v2253_v38 }
  0x1e   :  { %v2443_v52 = vld [vmem:[#allocation2 + $0x260] sm:$0xf]  ;;  %v3239_v53 = vld [vmem:[#allocation2 + $0x26c] sm:$0xf0]  ;;  %v2316_v57 = vor.u32 %v3207_v51, %v2315_v49  ;;  %1478 = vmatpush.bf16.msra.mxu3 %v2588_v50  ;;  %v3185_v50 = vld [vmem:[#allocation2 + $0xc4] sm:$0xf] }
  0x1f   :  { %v2571_v54 = vld [vmem:[#allocation2 + $0x360] sm:$0xf]  ;;  %v3271_v55 = vld [vmem:[#allocation2 + $0x36c] sm:$0xf0]  ;;  %v2444_v58 = vor.u32 %v3239_v53, %v2443_v52  ;;  %1440 = vmatpush.bf16.msra.mxu0 %v2188_v56  ;;  %v2237_v51 = vld [vmem:[#allocation2 + $0xd0] sm:$0xf0] }
  0x20   :  { %v2171_v59 = vld [vmem:[#allocation2 + $0x40] sm:$0xf]  ;;  %v3171_v60 = vld [vmem:[#allocation2 + $0x4c] sm:$0xf0]  ;;  %v2572_v62 = vor.u32 %v3271_v55, %v2571_v54  ;;  %1453 = vmatpush.bf16.msra.mxu1 %v2316_v57 }
  0x21   :  { %v2299_v61 = vld [vmem:[#allocation2 + $0x140] sm:$0xf]  ;;  %v3203_v63 = vld [vmem:[#allocation2 + $0x14c] sm:$0xf0]  ;;  %v2172_v4 = vor.u32 %v3171_v60, %v2171_v59  ;;  %1466 = vmatpush.bf16.msra.mxu2 %v2444_v58  ;;  %v2240_v59 = vor.u32 %v3185_v50, %v2237_v51 }
  0x22   :  { %v2427_v0 = vld [vmem:[#allocation2 + $0x240] sm:$0xf]  ;;  %v3235_v1 = vld [vmem:[#allocation2 + $0x24c] sm:$0xf0]  ;;  %v2300_v5 = vor.u32 %v3203_v63, %v2299_v61  ;;  %1479 = vmatpush.bf16.msra.mxu3 %v2572_v62  ;;  %v3181_v62 = vld [vmem:[#allocation2 + $0xa4] sm:$0xf] }
  0x23   :  { %v2555_v2 = vld [vmem:[#allocation2 + $0x340] sm:$0xf]  ;;  %v3267_v3 = vld [vmem:[#allocation2 + $0x34c] sm:$0xf0]  ;;  %v2428_v6 = vor.u32 %v3235_v1, %v2427_v0  ;;  %1441 = vmatpush.bf16.msra.mxu0 %v2172_v4  ;;  %v2221_v63 = vld [vmem:[#allocation2 + $0xb0] sm:$0xf0] }
  0x24   :  { %v2155_v7 = vld [vmem:[#allocation2 + $0x20] sm:$0xf]  ;;  %v3167_v8 = vld [vmem:[#allocation2 + $0x2c] sm:$0xf0]  ;;  %v2556_v10 = vor.u32 %v3267_v3, %v2555_v2  ;;  %1454 = vmatpush.bf16.msra.mxu1 %v2300_v5  ;;  %v54_v2 = vld [vmem:[%s3639_s0 + $0x8] sm:$0xff] }
  0x25   :  { %v2283_v9 = vld [vmem:[#allocation2 + $0x120] sm:$0xf]  ;;  %v3199_v11 = vld [vmem:[#allocation2 + $0x12c] sm:$0xf0]  ;;  %v2156_v16 = vor.u32 %v3167_v8, %v2155_v7  ;;  %1467 = vmatpush.bf16.msra.mxu2 %v2428_v6  ;;  %v297_v8 = vunpack.c.l.b16 %v54_v2 }
  0x26   :  { %v2411_v12 = vld [vmem:[#allocation2 + $0x220] sm:$0xf]  ;;  %v3231_v13 = vld [vmem:[#allocation2 + $0x22c] sm:$0xf0]  ;;  %v2284_v19 = vor.u32 %v3199_v11, %v2283_v9  ;;  %1480 = vmatpush.bf16.msra.mxu3 %v2556_v10  ;;  %v298_v10 = vunpack.c.h.b16 %v54_v2  ;;  %v2224_v11 = vor.u32 %v3181_v62, %v2221_v63 }
  0x27   :  { %v2539_v14 = vld [vmem:[#allocation2 + $0x320] sm:$0xf]  ;;  %v3263_v15 = vld [vmem:[#allocation2 + $0x32c] sm:$0xf0]  ;;  %v2412_v20 = vor.u32 %v3231_v13, %v2411_v12  ;;  %1442 = vmatpush.bf16.msra.mxu0 %v2156_v16  ;;  %v3177_v16 = vld [vmem:[#allocation2 + $0x84] sm:$0xf] }
  0x28   :  { %v2139_v17 = vld [vmem:[#allocation2] sm:$0xf]  ;;  %v3163_v18 = vld [vmem:[#allocation2 + $0xc] sm:$0xf0]  ;;  %v2540_v24 = vor.u32 %v3263_v15, %v2539_v14  ;;  %1455 = vmatpush.bf16.msra.mxu1 %v2284_v19 }
  0x29   :  { %v2267_v21 = vld [vmem:[#allocation2 + $0x100] sm:$0xf]  ;;  %v3195_v22 = vld [vmem:[#allocation2 + $0x10c] sm:$0xf0]  ;;  %v2140_v31 = vor.u32 %v3163_v18, %v2139_v17  ;;  %1468 = vmatpush.bf16.msra.mxu2 %v2412_v20  ;;  %v2205_v17 = vld [vmem:[#allocation2 + $0x90] sm:$0xf0]  ;;  %v3552_v18 = vpack.c.b16 %v297_v8, %v297_v8  ;;  %v3556_v20 = vpack.c.b16 %v298_v10, %v298_v10 }
  0x2a   :  { %v2395_v23 = vld [vmem:[#allocation2 + $0x200] sm:$0xf]  ;;  %v3227_v25 = vld [vmem:[#allocation2 + $0x20c] sm:$0xf0]  ;;  %v2268_v35 = vor.u32 %v3195_v22, %v2267_v21  ;;  %1481 = vmatpush.bf16.msra.mxu3 %v2540_v24  ;;  %v3221_v8 = vld [vmem:[#allocation2 + $0x1e4] sm:$0xf] }
  0x2b   :  { %v2523_v26 = vld [vmem:[#allocation2 + $0x300] sm:$0xf]  ;;  %v3259_v27 = vld [vmem:[#allocation2 + $0x30c] sm:$0xf0]  ;;  %v2396_v36 = vor.u32 %v3227_v25, %v2395_v23  ;;  %1443 = vmatpush.bf16.msra.mxu0 %v2140_v31  ;;  %v3253_v10 = vld [vmem:[#allocation2 + $0x2e4] sm:$0xf] }
  0x2c   :  { %v2763_v28 = vld [vmem:[#allocation2 + $0x4e0] sm:$0xf]  ;;  %v3319_v29 = vld [vmem:[#allocation2 + $0x4ec] sm:$0xf0]  ;;  %v2524_v39 = vor.u32 %v3259_v27, %v2523_v26  ;;  %1456 = vmatpush.bf16.msra.mxu1 %v2268_v35 }
  0x2d   :  { %v2891_v30 = vld [vmem:[#allocation2 + $0x5e0] sm:$0xf]  ;;  %v3351_v32 = vld [vmem:[#allocation2 + $0x5ec] sm:$0xf0]  ;;  %v2764_v40 = vor.u32 %v3319_v29, %v2763_v28  ;;  %1469 = vmatpush.bf16.msra.mxu2 %v2396_v36  ;;  %v2208_v28 = vor.u32 %v3177_v16, %v2205_v17 }
  0x2e   :  { %v3019_v33 = vld [vmem:[#allocation2 + $0x6e0] sm:$0xf]  ;;  %v3383_v34 = vld [vmem:[#allocation2 + $0x6ec] sm:$0xf0]  ;;  %v2892_v41 = vor.u32 %v3351_v32, %v2891_v30  ;;  %1482 = vmatpush.bf16.msra.mxu3 %v2524_v39  ;;  %v3173_v32 = vld [vmem:[#allocation2 + $0x64] sm:$0xf] }
  0x2f   :  { %v3020_v42 = vor.u32 %v3383_v34, %v3019_v33  ;;  %v2747_v43 = vld [vmem:[#allocation2 + $0x4c0] sm:$0xf]  ;;  %v3315_v44 = vld [vmem:[#allocation2 + $0x4cc] sm:$0xf0]  ;;  %1488 = vmatpush.bf16.msrb.mxu0 %v2764_v40  ;;  %v2189_v33 = vld [vmem:[#allocation2 + $0x70] sm:$0xf0] }
  0x30   :  { %v2875_v45 = vld [vmem:[#allocation2 + $0x5c0] sm:$0xf]  ;;  %v3347_v47 = vld [vmem:[#allocation2 + $0x5cc] sm:$0xf0]  ;;  %v2748_v52 = vor.u32 %v3315_v44, %v2747_v43  ;;  %1501 = vmatpush.bf16.msrb.mxu1 %v2892_v41  ;;  %1470 = vmatmul.bf16.vlgmr.msra.gmra.mxu2 %v3552_v18  ;;  %v2192_v40 = vor.u32 %v3173_v32, %v2189_v33  ;;  %v3169_v44 = vld [vmem:[#allocation2 + $0x44] sm:$0xf] }
  0x31   :  { %v3003_v48 = vld [vmem:[#allocation2 + $0x6c0] sm:$0xf]  ;;  %v3379_v49 = vld [vmem:[#allocation2 + $0x6cc] sm:$0xf0]  ;;  %1514 = vmatpush.bf16.msrb.mxu2 %v3020_v42  ;;  %v2876_v54 = vor.u32 %v3347_v47, %v2875_v45  ;;  %1483 = vmatmul.bf16.vlgmr.msra.gmra.mxu3 %v3556_v20  ;;  %v2173_v45 = vld [vmem:[#allocation2 + $0x50] sm:$0xf0] }
  0x32   :  { %v2731_v53 = vld [vmem:[#allocation2 + $0x4a0] sm:$0xf]  ;;  %v3004_v55 = vor.u32 %v3379_v49, %v3003_v48  ;;  %v3311_v56 = vld [vmem:[#allocation2 + $0x4ac] sm:$0xf0]  ;;  %1527 = vmatpush.bf16.msrb.mxu3 %v2256_v46  ;;  %v3249_v32 = vld [vmem:[#allocation2 + $0x2c4] sm:$0xf] }
  0x33   :  { %v2859_v57 = vld [vmem:[#allocation2 + $0x5a0] sm:$0xf]  ;;  %v3343_v58 = vld [vmem:[#allocation2 + $0x5ac] sm:$0xf0]  ;;  %1489 = vmatpush.bf16.msrb.mxu0 %v2748_v52  ;;  %v2732_v0 = vor.u32 %v3311_v56, %v2731_v53  ;;  %v2176_v52 = vor.u32 %v3169_v44, %v2173_v45  ;;  %v3165_v56 = vld [vmem:[#allocation2 + $0x24] sm:$0xf] }
  0x34   :  { %v2987_v60 = vld [vmem:[#allocation2 + $0x6a0] sm:$0xf]  ;;  %v3375_v61 = vld [vmem:[#allocation2 + $0x6ac] sm:$0xf0]  ;;  %v2860_v1 = vor.u32 %v3343_v58, %v2859_v57  ;;  %1502 = vmatpush.bf16.msrb.mxu1 %v2876_v54  ;;  %v2157_v57 = vld [vmem:[#allocation2 + $0x30] sm:$0xf0] }
  0x35   :  { %v53_v3 = vld [vmem:[%s3639_s0] sm:$0xff]  ;;  %1515 = vmatpush.bf16.msrb.mxu2 %v3004_v55  ;;  %v2988_v4 = vor.u32 %v3375_v61, %v2987_v60  ;;  %v3307_v6 = vld [vmem:[#allocation2 + $0x48c] sm:$0xf0] }
  0x36   :  { %v2715_v5 = vld [vmem:[#allocation2 + $0x480] sm:$0xf]  ;;  %v295_v9 = vunpack.c.l.b16 %v53_v3  ;;  %1528 = vmatpush.bf16.msrb.mxu3 %v2240_v59  ;;  %v3339_v12 = vld [vmem:[#allocation2 + $0x58c] sm:$0xf0]  ;;  %v296_v15 = vunpack.c.h.b16 %v53_v3  ;;  %v56_v3 = vld [vmem:[%s3639_s0 + $0x18] sm:$0xf] }
  0x37   :  { %v2843_v7 = vld [vmem:[#allocation2 + $0x580] sm:$0xf]  ;;  %v3371_v14 = vld [vmem:[#allocation2 + $0x68c] sm:$0xf0]  ;;  %1490 = vmatpush.bf16.msrb.mxu0 %v2732_v0  ;;  %v2716_v21 = vor.u32 %v3307_v6, %v2715_v5  ;;  %v3161_v5 = vld [vmem:[#allocation2 + $0x4] sm:$0xf] }
  0x38   :  { %v2971_v13 = vld [vmem:[#allocation2 + $0x680] sm:$0xf]  ;;  %v3554_v19 = vpack.c.b16 %v295_v9, %v295_v9  ;;  %v3558_v22 = vpack.c.b16 %v296_v15, %v296_v15  ;;  %1503 = vmatpush.bf16.msrb.mxu1 %v2860_v1  ;;  %v2844_v23 = vor.u32 %v3339_v12, %v2843_v7  ;;  %v3303_v26 = vld [vmem:[#allocation2 + $0x46c] sm:$0xf0]  ;;  %v2141_v6 = vld [vmem:[#allocation2 + $0x10] sm:$0xf0]  ;;  %v301_v15 = vunpack.c.l.b16 %v56_v3 }
  0x39   :  { %1516 = vmatpush.bf16.msrb.mxu2 %v2988_v4  ;;  %v2972_v24 = vor.u32 %v3371_v14, %v2971_v13  ;;  %v2699_v25 = vld [vmem:[#allocation2 + $0x460] sm:$0xf]  ;;  %v3335_v29 = vld [vmem:[#allocation2 + $0x56c] sm:$0xf0]  ;;  %v2160_v4 = vor.u32 %v3165_v56, %v2157_v57  ;;  %v2381_v9 = vld [vmem:[#allocation2 + $0x1f0] sm:$0xf0] }
  0x3a   :  { %v2827_v27 = vld [vmem:[#allocation2 + $0x560] sm:$0xf]  ;;  %1529 = vmatpush.bf16.msrb.mxu3 %v2224_v11  ;;  %v3367_v31 = vld [vmem:[#allocation2 + $0x66c] sm:$0xf0]  ;;  %1444 = vmatmul.bf16.vlgmr.msra.gmra.mxu0 %v3554_v19  ;;  %v2700_v34 = vor.u32 %v3303_v26, %v2699_v25  ;;  %v2509_v12 = vld [vmem:[#allocation2 + $0x2f0] sm:$0xf0]  ;;  %v2144_v26 = vor.u32 %v3161_v5, %v2141_v6 }
  0x3b   :  { %v2955_v30 = vld [vmem:[#allocation2 + $0x660] sm:$0xf]  ;;  %1491 = vmatpush.bf16.msrb.mxu0 %v2716_v21  ;;  %1457 = vmatmul.bf16.vlgmr.msra.gmra.mxu1 %v3558_v22  ;;  %v2828_v35 = vor.u32 %v3335_v29, %v2827_v27  ;;  %v3299_v38 = vld [vmem:[#allocation2 + $0x44c] sm:$0xf0]  ;;  %v3285_v13 = vld [vmem:[#allocation2 + $0x3e4] sm:$0xf]  ;;  %v2384_v27 = vor.u32 %v3221_v8, %v2381_v9 }
  0x3c   :  { %1504 = vmatpush.bf16.msrb.mxu1 %v2844_v23  ;;  %v2956_v36 = vor.u32 %v3367_v31, %v2955_v30  ;;  %v2683_v37 = vld [vmem:[#allocation2 + $0x440] sm:$0xf]  ;;  %v3331_v41 = vld [vmem:[#allocation2 + $0x54c] sm:$0xf0]  ;;  %v2637_v14 = vld [vmem:[#allocation2 + $0x3f0] sm:$0xf0] }
  0x3d   :  { %1517 = vmatpush.bf16.msrb.mxu2 %v2972_v24  ;;  %v2811_v39 = vld [vmem:[#allocation2 + $0x540] sm:$0xf]  ;;  %v3363_v43 = vld [vmem:[#allocation2 + $0x64c] sm:$0xf0]  ;;  %v2684_v46 = vor.u32 %v3299_v38, %v2683_v37  ;;  %v3317_v21 = vld [vmem:[#allocation2 + $0x4e4] sm:$0xf]  ;;  %v2640_v29 = vor.u32 %v3285_v13, %v2637_v14  ;;  %v3570_v37 = vpack.c.b16 %v301_v15, %v301_v15 }
  0x3e   :  { %1530 = vmatpush.bf16.msrb.mxu3 %v2208_v28  ;;  %v2939_v42 = vld [vmem:[#allocation2 + $0x640] sm:$0xf]  ;;  %v2812_v47 = vor.u32 %v3331_v41, %v2811_v39  ;;  %v3295_v50 = vld [vmem:[#allocation2 + $0x42c] sm:$0xf0]  ;;  %v2765_v23 = vld [vmem:[#allocation2 + $0x4f0] sm:$0xf0]  ;;  %v2512_v28 = vor.u32 %v3253_v10, %v2509_v12 }
  0x3f   :  { %1492 = vmatpush.bf16.msrb.mxu0 %v2700_v34  ;;  %v2940_v48 = vor.u32 %v3363_v43, %v2939_v42  ;;  %v2667_v49 = vld [vmem:[#allocation2 + $0x420] sm:$0xf]  ;;  %v3327_v53 = vld [vmem:[#allocation2 + $0x52c] sm:$0xf0]  ;;  %v3217_v30 = vld [vmem:[#allocation2 + $0x1c4] sm:$0xf]  ;;  %v2768_v33 = vor.u32 %v3317_v21, %v2765_v23 }
  0x40   :  { %1505 = vmatpush.bf16.msrb.mxu1 %v2828_v35  ;;  %v2795_v51 = vld [vmem:[#allocation2 + $0x520] sm:$0xf]  ;;  %v3359_v55 = vld [vmem:[#allocation2 + $0x62c] sm:$0xf0]  ;;  %v2668_v59 = vor.u32 %v3295_v50, %v2667_v49  ;;  %v2365_v31 = vld [vmem:[#allocation2 + $0x1d0] sm:$0xf0] }
  0x41   :  { %1518 = vmatpush.bf16.msrb.mxu2 %v2956_v36  ;;  %v2923_v54 = vld [vmem:[#allocation2 + $0x620] sm:$0xf]  ;;  %v3291_v60 = vld [vmem:[#allocation2 + $0x40c] sm:$0xf0]  ;;  %v2796_v63 = vor.u32 %v3327_v53, %v2795_v51  ;;  %v2493_v34 = vld [vmem:[#allocation2 + $0x2d0] sm:$0xf0]  ;;  %v2368_v42 = vor.u32 %v3217_v30, %v2365_v31 }
  0x42   :  { %1531 = vmatpush.bf16.msrb.mxu3 %v2192_v40  ;;  %v2651_v58 = vld [vmem:[#allocation2 + $0x400] sm:$0xf]  ;;  %v3323_v62 = vld [vmem:[#allocation2 + $0x50c] sm:$0xf0]  ;;  %v2924_v0 = vor.u32 %v3359_v55, %v2923_v54  ;;  %v3281_v35 = vld [vmem:[#allocation2 + $0x3c4] sm:$0xf]  ;;  %v2496_v43 = vor.u32 %v3249_v32, %v2493_v34 }
  0x43   :  { %1493 = vmatpush.bf16.msrb.mxu0 %v2684_v46  ;;  %v2779_v61 = vld [vmem:[#allocation2 + $0x500] sm:$0xf]  ;;  %v3355_v2 = vld [vmem:[#allocation2 + $0x60c] sm:$0xf0]  ;;  %v2652_v11 = vor.u32 %v3291_v60, %v2651_v58  ;;  %v2621_v36 = vld [vmem:[#allocation2 + $0x3d0] sm:$0xf0] }
  0x44   :  { %1506 = vmatpush.bf16.msrb.mxu1 %v2812_v47  ;;  %v2907_v1 = vld [vmem:[#allocation2 + $0x600] sm:$0xf]  ;;  %v55_v7 = vld [vmem:[%s3639_s0 + $0x10] sm:$0xff]  ;;  %v2780_v16 = vor.u32 %v3323_v62, %v2779_v61  ;;  %v3313_v38 = vld [vmem:[#allocation2 + $0x4c4] sm:$0xf]  ;;  %v2624_v44 = vor.u32 %v3281_v35, %v2621_v36 }
  0x45   :  { %1519 = vmatpush.bf16.msrb.mxu2 %v2940_v48  ;;  %v2908_v17 = vor.u32 %v3355_v2, %v2907_v1  ;;  %v299_v24 = vunpack.c.l.b16 %v55_v7  ;;  %v300_v25 = vunpack.c.h.b16 %v55_v7  ;;  %v2749_v39 = vld [vmem:[#allocation2 + $0x4d0] sm:$0xf0]  ;;  %v3213_v45 = vld [vmem:[#allocation2 + $0x1a4] sm:$0xf] }
  0x46   :  { %1532 = vmatpush.bf16.msrb.mxu3 %v2176_v52  ;;  %v2349_v46 = vld [vmem:[#allocation2 + $0x1b0] sm:$0xf0]  ;;  %v3245_v47 = vld [vmem:[#allocation2 + $0x2a4] sm:$0xf]  ;;  %v2752_v48 = vor.u32 %v3313_v38, %v2749_v39 }
  0x47   :  { %1494 = vmatpush.bf16.msrb.mxu0 %v2668_v59  ;;  %v3572_v40 = vpack.c.b16 %v299_v24, %v299_v24  ;;  %v3574_v41 = vpack.c.b16 %v300_v25, %v300_v25  ;;  %v2477_v49 = vld [vmem:[#allocation2 + $0x2b0] sm:$0xf0]  ;;  %v3277_v50 = vld [vmem:[#allocation2 + $0x3a4] sm:$0xf]  ;;  %v2352_v54 = vor.u32 %v3213_v45, %v2349_v46 }
  0x48   :  { %1507 = vmatpush.bf16.msrb.mxu1 %v2796_v63  ;;  %v2605_v51 = vld [vmem:[#allocation2 + $0x3b0] sm:$0xf0]  ;;  %v3309_v52 = vld [vmem:[#allocation2 + $0x4a4] sm:$0xf]  ;;  %v2480_v55 = vor.u32 %v3245_v47, %v2477_v49 }
  0x49   :  { %1520 = vmatpush.bf16.msrb.mxu2 %v2924_v0  ;;  %v2733_v53 = vld [vmem:[#allocation2 + $0x4b0] sm:$0xf0]  ;;  %v2608_v56 = vor.u32 %v3277_v50, %v2605_v51  ;;  %v3209_v57 = vld [vmem:[#allocation2 + $0x184] sm:$0xf] }
  0x4a   :  { %1533 = vmatpush.bf16.msrb.mxu3 %v2160_v4  ;;  %v2333_v58 = vld [vmem:[#allocation2 + $0x190] sm:$0xf0]  ;;  %v3241_v59 = vld [vmem:[#allocation2 + $0x284] sm:$0xf]  ;;  %v2736_v60 = vor.u32 %v3309_v52, %v2733_v53 }
  0x4b   :  { %1495 = vmatpush.bf16.msrb.mxu0 %v2652_v11  ;;  %v2461_v61 = vld [vmem:[#allocation2 + $0x290] sm:$0xf0]  ;;  %v3273_v62 = vld [vmem:[#allocation2 + $0x384] sm:$0xf]  ;;  %v2336_v2 = vor.u32 %v3209_v57, %v2333_v58 }
  0x4c   :  { %1508 = vmatpush.bf16.msrb.mxu1 %v2780_v16  ;;  %v2589_v63 = vld [vmem:[#allocation2 + $0x390] sm:$0xf0]  ;;  %v3305_v0 = vld [vmem:[#allocation2 + $0x484] sm:$0xf]  ;;  %v2464_v3 = vor.u32 %v3241_v59, %v2461_v61 }
  0x4d   :  { %1521 = vmatpush.bf16.msrb.mxu2 %v2908_v17  ;;  %v2717_v1 = vld [vmem:[#allocation2 + $0x490] sm:$0xf0]  ;;  %v2592_v4 = vor.u32 %v3273_v62, %v2589_v63  ;;  %v3205_v5 = vld [vmem:[#allocation2 + $0x164] sm:$0xf]  ;;  %v2259_v62 = vld [vmem:[#allocation2 + $0xe8] sm:$0xf] }
  0x4e   :  { %1534 = vmatpush.bf16.msrb.mxu3 %v2144_v26  ;;  %1496 = vmatmul.bf16.vlgmr.msrb.gmra.mxu0 %v3572_v40  ;;  %v2317_v6 = vld [vmem:[#allocation2 + $0x170] sm:$0xf0]  ;;  %v3237_v7 = vld [vmem:[#allocation2 + $0x264] sm:$0xf]  ;;  %v2720_v8 = vor.u32 %v3305_v0, %v2717_v1  ;;  %v3192_v63 = vld [vmem:[#allocation2 + $0xf4] sm:$0xf0] }
  0x4f   :  { %1540 = vmatpush.bf16.msra.mxu0 %v2384_v27  ;;  %1509 = vmatmul.bf16.vlgmr.msrb.gmra.mxu1 %v3574_v41  ;;  %v2445_v9 = vld [vmem:[#allocation2 + $0x270] sm:$0xf0]  ;;  %v3269_v10 = vld [vmem:[#allocation2 + $0x364] sm:$0xf]  ;;  %v2320_v14 = vor.u32 %v3205_v5, %v2317_v6 }
  0x50   :  { %1553 = vmatpush.bf16.msra.mxu1 %v2512_v28  ;;  %1522 = vmatmul.bf16.vlgmr.msrb.gmra.mxu2 %v3570_v37  ;;  %v2573_v11 = vld [vmem:[#allocation2 + $0x370] sm:$0xf0]  ;;  %v3301_v12 = vld [vmem:[#allocation2 + $0x464] sm:$0xf]  ;;  %v2448_v15 = vor.u32 %v3237_v7, %v2445_v9  ;;  %v2260_v7 = vor.u32 %v3192_v63, %v2259_v62 }
  0x51   :  { %1566 = vmatpush.bf16.msra.mxu2 %v2640_v29  ;;  %1535 = vmatmul.bf16.vlgmr.msrb.gmra.mxu3 %v3554_v19  ;;  %v2701_v13 = vld [vmem:[#allocation2 + $0x470] sm:$0xf0]  ;;  %v2576_v16 = vor.u32 %v3269_v10, %v2573_v11  ;;  %v3201_v17 = vld [vmem:[#allocation2 + $0x144] sm:$0xf] }
  0x52   :  { %1579 = vmatpush.bf16.msra.mxu3 %v2768_v33  ;;  %v2301_v21 = vld [vmem:[#allocation2 + $0x150] sm:$0xf0]  ;;  %v3233_v23 = vld [vmem:[#allocation2 + $0x244] sm:$0xf]  ;;  %v2704_v24 = vor.u32 %v3301_v12, %v2701_v13  ;;  %v2243_v13 = vld [vmem:[#allocation2 + $0xc8] sm:$0xf] }
  0x53   :  { %1541 = vmatpush.bf16.msra.mxu0 %v2368_v42  ;;  %v2429_v25 = vld [vmem:[#allocation2 + $0x250] sm:$0xf0]  ;;  %v3265_v26 = vld [vmem:[#allocation2 + $0x344] sm:$0xf]  ;;  %v2304_v30 = vor.u32 %v3201_v17, %v2301_v21 }
  0x54   :  { %1554 = vmatpush.bf16.msra.mxu1 %v2496_v43  ;;  %v2557_v27 = vld [vmem:[#allocation2 + $0x350] sm:$0xf0]  ;;  %v3297_v28 = vld [vmem:[#allocation2 + $0x444] sm:$0xf]  ;;  %v2432_v31 = vor.u32 %v3233_v23, %v2429_v25 }
  0x55   :  { %1567 = vmatpush.bf16.msra.mxu2 %v2624_v44  ;;  %v2685_v29 = vld [vmem:[#allocation2 + $0x450] sm:$0xf0]  ;;  %v2560_v32 = vor.u32 %v3265_v26, %v2557_v27  ;;  %v3197_v33 = vld [vmem:[#allocation2 + $0x124] sm:$0xf] }
  0x56   :  { %1580 = vmatpush.bf16.msra.mxu3 %v2752_v48  ;;  %v2285_v34 = vld [vmem:[#allocation2 + $0x130] sm:$0xf0]  ;;  %v3229_v35 = vld [vmem:[#allocation2 + $0x224] sm:$0xf]  ;;  %v2688_v36 = vor.u32 %v3297_v28, %v2685_v29  ;;  %v2227_v29 = vld [vmem:[#allocation2 + $0xa8] sm:$0xf] }
  0x57   :  { %1542 = vmatpush.bf16.msra.mxu0 %v2352_v54  ;;  %v2413_v38 = vld [vmem:[#allocation2 + $0x230] sm:$0xf0]  ;;  %v3261_v39 = vld [vmem:[#allocation2 + $0x324] sm:$0xf]  ;;  %v2288_v45 = vor.u32 %v3197_v33, %v2285_v34 }
  0x58   :  { %1555 = vmatpush.bf16.msra.mxu1 %v2480_v55  ;;  %v2541_v42 = vld [vmem:[#allocation2 + $0x330] sm:$0xf0]  ;;  %v3293_v43 = vld [vmem:[#allocation2 + $0x424] sm:$0xf]  ;;  %v2416_v48 = vor.u32 %v3229_v35, %v2413_v38 }
  0x59   :  { %1568 = vmatpush.bf16.msra.mxu2 %v2608_v56  ;;  %v2669_v44 = vld [vmem:[#allocation2 + $0x430] sm:$0xf0]  ;;  %v3193_v46 = vld [vmem:[#allocation2 + $0x104] sm:$0xf]  ;;  %v2544_v49 = vor.u32 %v3261_v39, %v2541_v42 }
  0x5a   :  { %1581 = vmatpush.bf16.msra.mxu3 %v2736_v60  ;;  %v2269_v47 = vld [vmem:[#allocation2 + $0x110] sm:$0xf0]  ;;  %v3225_v50 = vld [vmem:[#allocation2 + $0x204] sm:$0xf]  ;;  %v2672_v53 = vor.u32 %v3293_v43, %v2669_v44  ;;  %v2211_v44 = vld [vmem:[#allocation2 + $0x88] sm:$0xf] }
  0x5b   :  { %1543 = vmatpush.bf16.msra.mxu0 %v2336_v2  ;;  %v2397_v51 = vld [vmem:[#allocation2 + $0x210] sm:$0xf0]  ;;  %v3257_v52 = vld [vmem:[#allocation2 + $0x304] sm:$0xf]  ;;  %v2272_v60 = vor.u32 %v3193_v46, %v2269_v47  ;;  %v2387_v2 = vld [vmem:[#allocation2 + $0x1e8] sm:$0xf] }
  0x5c   :  { %1556 = vmatpush.bf16.msra.mxu1 %v2464_v3  ;;  %v2525_v54 = vld [vmem:[#allocation2 + $0x310] sm:$0xf0]  ;;  %v3289_v55 = vld [vmem:[#allocation2 + $0x404] sm:$0xf]  ;;  %v2400_v0 = vor.u32 %v3225_v50, %v2397_v51  ;;  %v3224_v3 = vld [vmem:[#allocation2 + $0x1f4] sm:$0xf0] }
  0x5d   :  { %1569 = vmatpush.bf16.msra.mxu2 %v2592_v4  ;;  %v2653_v56 = vld [vmem:[#allocation2 + $0x410] sm:$0xf0]  ;;  %v3349_v57 = vld [vmem:[#allocation2 + $0x5e4] sm:$0xf]  ;;  %v2528_v1 = vor.u32 %v3257_v52, %v2525_v54  ;;  %v2388_v11 = vor.u32 %v3224_v3, %v2387_v2  ;;  %v2339_v46 = vld [vmem:[#allocation2 + $0x188] sm:$0xf] }
  0x5e   :  { %1582 = vmatpush.bf16.msra.mxu3 %v2720_v8  ;;  %v2893_v58 = vld [vmem:[#allocation2 + $0x5f0] sm:$0xf0]  ;;  %v3381_v59 = vld [vmem:[#allocation2 + $0x6e4] sm:$0xf]  ;;  %v2656_v4 = vor.u32 %v3289_v55, %v2653_v56  ;;  %v3212_v47 = vld [vmem:[#allocation2 + $0x194] sm:$0xf0] }
  0x5f   :  { %1544 = vmatpush.bf16.msra.mxu0 %v2320_v14  ;;  %v3021_v61 = vld [vmem:[#allocation2 + $0x6f0] sm:$0xf0]  ;;  %v2896_v5 = vor.u32 %v3349_v57, %v2893_v58  ;;  %v3345_v8 = vld [vmem:[#allocation2 + $0x5c4] sm:$0xf]  ;;  %v3188_v14 = vld [vmem:[#allocation2 + $0xd4] sm:$0xf0]  ;;  %v2340_v54 = vor.u32 %v3212_v47, %v2339_v46 }
  0x60   :  { %1557 = vmatpush.bf16.msra.mxu1 %v2448_v15  ;;  %v3024_v6 = vor.u32 %v3381_v59, %v3021_v61  ;;  %v2877_v9 = vld [vmem:[#allocation2 + $0x5d0] sm:$0xf0]  ;;  %v3377_v10 = vld [vmem:[#allocation2 + $0x6c4] sm:$0xf]  ;;  %v2371_v15 = vld [vmem:[#allocation2 + $0x1c8] sm:$0xf]  ;;  %v2244_v23 = vor.u32 %v3188_v14, %v2243_v13 }
  0x61   :  { %1570 = vmatpush.bf16.msra.mxu2 %v2576_v16  ;;  %v3005_v12 = vld [vmem:[#allocation2 + $0x6d0] sm:$0xf0]  ;;  %v3220_v16 = vld [vmem:[#allocation2 + $0x1d4] sm:$0xf0]  ;;  %v2880_v17 = vor.u32 %v3345_v8, %v2877_v9  ;;  %v3373_v26 = vld [vmem:[#allocation2 + $0x6a4] sm:$0xf] }
  0x62   :  { %1583 = vmatpush.bf16.msra.mxu3 %v2704_v24  ;;  %v3008_v21 = vor.u32 %v3377_v10, %v3005_v12  ;;  %v3341_v24 = vld [vmem:[#allocation2 + $0x5a4] sm:$0xf]  ;;  %v2861_v25 = vld [vmem:[#allocation2 + $0x5b0] sm:$0xf0]  ;;  %v2372_v27 = vor.u32 %v3220_v16, %v2371_v15  ;;  %v2195_v56 = vld [vmem:[#allocation2 + $0x68] sm:$0xf] }
  0x63   :  { %1545 = vmatpush.bf16.msra.mxu0 %v2304_v30  ;;  %v2989_v28 = vld [vmem:[#allocation2 + $0x6b0] sm:$0xf0]  ;;  %v3184_v30 = vld [vmem:[#allocation2 + $0xb4] sm:$0xf0]  ;;  %v2864_v33 = vor.u32 %v3341_v24, %v2861_v25  ;;  %v3369_v39 = vld [vmem:[#allocation2 + $0x684] sm:$0xf] }
  0x64   :  { %1558 = vmatpush.bf16.msra.mxu1 %v2432_v31  ;;  %v2355_v31 = vld [vmem:[#allocation2 + $0x1a8] sm:$0xf]  ;;  %v2992_v34 = vor.u32 %v3373_v26, %v2989_v28  ;;  %v2228_v35 = vor.u32 %v3184_v30, %v2227_v29  ;;  %v2845_v38 = vld [vmem:[#allocation2 + $0x590] sm:$0xf0]  ;;  %v3333_v51 = vld [vmem:[#allocation2 + $0x564] sm:$0xf] }
  0x65   :  { %1571 = vmatpush.bf16.msra.mxu2 %v2560_v32  ;;  %v3216_v32 = vld [vmem:[#allocation2 + $0x1b4] sm:$0xf0]  ;;  %v2973_v43 = vld [vmem:[#allocation2 + $0x690] sm:$0xf0]  ;;  %v2323_v58 = vld [vmem:[#allocation2 + $0x168] sm:$0xf] }
  0x66   :  { %1584 = vmatpush.bf16.msra.mxu3 %v2688_v36  ;;  %v3337_v36 = vld [vmem:[#allocation2 + $0x584] sm:$0xf]  ;;  %v2356_v42 = vor.u32 %v3216_v32, %v2355_v31  ;;  %v2829_v52 = vld [vmem:[#allocation2 + $0x570] sm:$0xf0]  ;;  %v3176_v57 = vld [vmem:[#allocation2 + $0x74] sm:$0xf0] }
  0x67   :  { %1546 = vmatpush.bf16.msra.mxu0 %v2288_v45  ;;  %v3180_v45 = vld [vmem:[#allocation2 + $0x94] sm:$0xf0]  ;;  %v2957_v55 = vld [vmem:[#allocation2 + $0x670] sm:$0xf0]  ;;  %v2196_v62 = vor.u32 %v3176_v57, %v2195_v56  ;;  %v3329_v63 = vld [vmem:[#allocation2 + $0x544] sm:$0xf] }
  0x68   :  { %1559 = vmatpush.bf16.msra.mxu1 %v2416_v48  ;;  %v2848_v48 = vor.u32 %v3337_v36, %v2845_v38  ;;  %v2212_v50 = vor.u32 %v3180_v45, %v2211_v44  ;;  %v3208_v59 = vld [vmem:[#allocation2 + $0x174] sm:$0xf0]  ;;  %v2941_v3 = vld [vmem:[#allocation2 + $0x650] sm:$0xf0]  ;;  %v3357_v13 = vld [vmem:[#allocation2 + $0x624] sm:$0xf] }
  0x69   :  { %1572 = vmatpush.bf16.msra.mxu2 %v2544_v49  ;;  %v2976_v49 = vor.u32 %v3369_v39, %v2973_v43  ;;  %v2324_v2 = vor.u32 %v3208_v59, %v2323_v58  ;;  %v2797_v12 = vld [vmem:[#allocation2 + $0x530] sm:$0xf0]  ;;  %v2163_v16 = vld [vmem:[#allocation2 + $0x28] sm:$0xf]  ;;  %v3321_v25 = vld [vmem:[#allocation2 + $0x504] sm:$0xf] }
  0x6a   :  { %1585 = vmatpush.bf16.msra.mxu3 %v2672_v53  ;;  %v3365_v53 = vld [vmem:[#allocation2 + $0x664] sm:$0xf]  ;;  %v2925_v15 = vld [vmem:[#allocation2 + $0x630] sm:$0xf0]  ;;  %v2147_v31 = vld [vmem:[#allocation2 + $0x8] sm:$0xf] }
  0x6b   :  { %1547 = vmatpush.bf16.msra.mxu0 %v2272_v60  ;;  %v2832_v60 = vor.u32 %v3333_v51, %v2829_v52  ;;  %v2960_v61 = vor.u32 %v3365_v53, %v2957_v55  ;;  %v2781_v26 = vld [vmem:[#allocation2 + $0x510] sm:$0xf0]  ;;  %v3353_v29 = vld [vmem:[#allocation2 + $0x604] sm:$0xf]  ;;  %v2515_v36 = vld [vmem:[#allocation2 + $0x2e8] sm:$0xf] }
  0x6c   :  { %1560 = vmatpush.bf16.msra.mxu1 %v2400_v0  ;;  %v2813_v0 = vld [vmem:[#allocation2 + $0x550] sm:$0xf0]  ;;  %v3256_v38 = vld [vmem:[#allocation2 + $0x2f4] sm:$0xf0]  ;;  %v2643_v39 = vld [vmem:[#allocation2 + $0x3e8] sm:$0xf] }
  0x6d   :  { %1573 = vmatpush.bf16.msra.mxu2 %v2528_v1  ;;  %v3361_v1 = vld [vmem:[#allocation2 + $0x644] sm:$0xf]  ;;  %v2816_v8 = vor.u32 %v3329_v63, %v2813_v0  ;;  %v2909_v30 = vld [vmem:[#allocation2 + $0x610] sm:$0xf0]  ;;  %v3288_v43 = vld [vmem:[#allocation2 + $0x3f4] sm:$0xf0]  ;;  %v2516_v51 = vor.u32 %v3256_v38, %v2515_v36 }
  0x6e   :  { %1586 = vmatpush.bf16.msra.mxu3 %v2656_v4  ;;  %1548 = vmatmul.bf16.vlgmr.msra.gmra.mxu0 %v3558_v22  ;;  %v2179_v4 = vld [vmem:[#allocation2 + $0x48] sm:$0xf]  ;;  %v2944_v9 = vor.u32 %v3361_v1, %v2941_v3  ;;  %v3320_v45 = vld [vmem:[#allocation2 + $0x4f4] sm:$0xf0]  ;;  %v2912_v46 = vor.u32 %v3353_v29, %v2909_v30  ;;  %v2644_v52 = vor.u32 %v3288_v43, %v2643_v39 }
  0x6f   :  { %1592 = vmatpush.bf16.msrb.mxu0 %v2896_v5  ;;  %1561 = vmatmul.bf16.vlgmr.msra.gmra.mxu1 %v3552_v18  ;;  %v3172_v5 = vld [vmem:[#allocation2 + $0x54] sm:$0xf0]  ;;  %v2771_v44 = vld [vmem:[#allocation2 + $0x4e8] sm:$0xf] }
  0x70   :  { %1605 = vmatpush.bf16.msrb.mxu1 %v3024_v6  ;;  %1574 = vmatmul.bf16.vlgmr.msra.gmra.mxu2 %v3556_v20  ;;  %v2307_v6 = vld [vmem:[#allocation2 + $0x148] sm:$0xf]  ;;  %v2180_v10 = vor.u32 %v3172_v5, %v2179_v4  ;;  %v2772_v53 = vor.u32 %v3320_v45, %v2771_v44  ;;  %v3252_v55 = vld [vmem:[#allocation2 + $0x2d4] sm:$0xf0] }
  0x71   :  { %1618 = vmatpush.bf16.msrb.mxu2 %v2260_v7  ;;  %1587 = vmatmul.bf16.vlgmr.msra.gmra.mxu3 %v3572_v40  ;;  %v3204_v7 = vld [vmem:[#allocation2 + $0x154] sm:$0xf0]  ;;  %v2627_v56 = vld [vmem:[#allocation2 + $0x3c8] sm:$0xf] }
  0x72   :  { %1631 = vmatpush.bf16.msrb.mxu3 %v2388_v11  ;;  %v3325_v11 = vld [vmem:[#allocation2 + $0x524] sm:$0xf]  ;;  %v2308_v14 = vor.u32 %v3204_v7, %v2307_v6  ;;  %v3284_v58 = vld [vmem:[#allocation2 + $0x3d4] sm:$0xf0]  ;;  %v2755_v59 = vld [vmem:[#allocation2 + $0x4c8] sm:$0xf] }
  0x73   :  { %1593 = vmatpush.bf16.msrb.mxu0 %v2880_v17  ;;  %v3168_v17 = vld [vmem:[#allocation2 + $0x34] sm:$0xf0]  ;;  %v2800_v24 = vor.u32 %v3325_v11, %v2797_v12  ;;  %v2628_v0 = vor.u32 %v3284_v58, %v2627_v56  ;;  %v2611_v4 = vld [vmem:[#allocation2 + $0x3a8] sm:$0xf] }
  0x74   :  { %1606 = vmatpush.bf16.msrb.mxu1 %v3008_v21  ;;  %v2291_v21 = vld [vmem:[#allocation2 + $0x128] sm:$0xf]  ;;  %v2164_v28 = vor.u32 %v3168_v17, %v2163_v16  ;;  %v3248_v3 = vld [vmem:[#allocation2 + $0x2b4] sm:$0xf0] }
  0x75   :  { %1619 = vmatpush.bf16.msrb.mxu2 %v2244_v23  ;;  %v3200_v23 = vld [vmem:[#allocation2 + $0x134] sm:$0xf0]  ;;  %v2739_v7 = vld [vmem:[#allocation2 + $0x4a8] sm:$0xf] }
  0x76   :  { %1632 = vmatpush.bf16.msrb.mxu3 %v2372_v27  ;;  %v2928_v27 = vor.u32 %v3357_v13, %v2925_v15  ;;  %v2292_v32 = vor.u32 %v3200_v23, %v2291_v21  ;;  %v3280_v6 = vld [vmem:[#allocation2 + $0x3b4] sm:$0xf0]  ;;  %v2595_v16 = vld [vmem:[#allocation2 + $0x388] sm:$0xf] }
  0x77   :  { %1594 = vmatpush.bf16.msrb.mxu0 %v2864_v33  ;;  %v3164_v33 = vld [vmem:[#allocation2 + $0x14] sm:$0xf0]  ;;  %v2612_v12 = vor.u32 %v3280_v6, %v2611_v4  ;;  %v2723_v23 = vld [vmem:[#allocation2 + $0x488] sm:$0xf] }
  0x78   :  { %1607 = vmatpush.bf16.msrb.mxu1 %v2992_v34  ;;  %v2275_v34 = vld [vmem:[#allocation2 + $0x108] sm:$0xf]  ;;  %v2148_v47 = vor.u32 %v3164_v33, %v2147_v31  ;;  %v3244_v15 = vld [vmem:[#allocation2 + $0x294] sm:$0xf0] }
  0x79   :  { %1620 = vmatpush.bf16.msrb.mxu2 %v2228_v35  ;;  %v3196_v35 = vld [vmem:[#allocation2 + $0x114] sm:$0xf0]  ;;  %v2451_v30 = vld [vmem:[#allocation2 + $0x268] sm:$0xf] }
  0x7a   :  { %1633 = vmatpush.bf16.msrb.mxu3 %v2356_v42  ;;  %v2784_v42 = vor.u32 %v3321_v25, %v2781_v26  ;;  %v3276_v21 = vld [vmem:[#allocation2 + $0x394] sm:$0xf0]  ;;  %v2851_v25 = vld [vmem:[#allocation2 + $0x588] sm:$0xf] }
  0x7b   :  { %1595 = vmatpush.bf16.msrb.mxu0 %v2848_v48  ;;  %v2899_v48 = vld [vmem:[#allocation2 + $0x5e8] sm:$0xf]  ;;  %v3340_v26 = vld [vmem:[#allocation2 + $0x594] sm:$0xf0] }
  0x7c   :  { %1608 = vmatpush.bf16.msrb.mxu1 %v2976_v49  ;;  %v3352_v49 = vld [vmem:[#allocation2 + $0x5f4] sm:$0xf0]  ;;  %v2852_v33 = vor.u32 %v3340_v26, %v2851_v25  ;;  %v2835_v38 = vld [vmem:[#allocation2 + $0x568] sm:$0xf] }
  0x7d   :  { %1621 = vmatpush.bf16.msrb.mxu2 %v2212_v50  ;;  %v2276_v50 = vor.u32 %v3196_v35, %v2275_v34  ;;  %v2900_v57 = vor.u32 %v3352_v49, %v2899_v48  ;;  %v3240_v31 = vld [vmem:[#allocation2 + $0x274] sm:$0xf0]  ;;  %v2707_v35 = vld [vmem:[#allocation2 + $0x468] sm:$0xf] }
  0x7e   :  { %1634 = vmatpush.bf16.msrb.mxu3 %v2340_v54  ;;  %v2499_v54 = vld [vmem:[#allocation2 + $0x2c8] sm:$0xf]  ;;  %v3272_v34 = vld [vmem:[#allocation2 + $0x374] sm:$0xf0] }
  0x7f   :  { %1596 = vmatpush.bf16.msrb.mxu0 %v2832_v60  ;;  %v3316_v60 = vld [vmem:[#allocation2 + $0x4d4] sm:$0xf0]  ;;  %v2500_v63 = vor.u32 %v3252_v55, %v2499_v54  ;;  %v2435_v45 = vld [vmem:[#allocation2 + $0x248] sm:$0xf] }
  0x80   :  { %1609 = vmatpush.bf16.msrb.mxu1 %v2960_v61  ;;  %v2883_v61 = vld [vmem:[#allocation2 + $0x5c8] sm:$0xf]  ;;  %v2756_v1 = vor.u32 %v3316_v60, %v2755_v59  ;;  %v3304_v36 = vld [vmem:[#allocation2 + $0x474] sm:$0xf0] }
  0x81   :  { %1622 = vmatpush.bf16.msrb.mxu2 %v2196_v62  ;;  %v3348_v62 = vld [vmem:[#allocation2 + $0x5d4] sm:$0xf0]  ;;  %v2708_v44 = vor.u32 %v3304_v36, %v2707_v35  ;;  %v2547_v59 = vld [vmem:[#allocation2 + $0x328] sm:$0xf]  ;;  %v3186_v35 = vld [vmem:[#allocation2 + $0xcc] sm:$0xf] }
  0x82   :  { %1635 = vmatpush.bf16.msrb.mxu3 %v2324_v2  ;;  %v2483_v2 = vld [vmem:[#allocation2 + $0x2a8] sm:$0xf]  ;;  %v2884_v5 = vor.u32 %v3348_v62, %v2883_v61  ;;  %v3336_v39 = vld [vmem:[#allocation2 + $0x574] sm:$0xf0] }
  0x83   :  { %1597 = vmatpush.bf16.msrb.mxu0 %v2816_v8  ;;  %v3312_v8 = vld [vmem:[#allocation2 + $0x4b4] sm:$0xf0]  ;;  %v2484_v11 = vor.u32 %v3248_v3, %v2483_v2  ;;  %v2836_v48 = vor.u32 %v3336_v39, %v2835_v38  ;;  %v2675_v62 = vld [vmem:[#allocation2 + $0x428] sm:$0xf]  ;;  %v2245_v38 = vld [vmem:[#allocation2 + $0xd8] sm:$0xf0] }
  0x84   :  { %1610 = vmatpush.bf16.msrb.mxu1 %v2944_v9  ;;  %v2867_v9 = vld [vmem:[#allocation2 + $0x5a8] sm:$0xf]  ;;  %v2740_v13 = vor.u32 %v3312_v8, %v2739_v7  ;;  %v3268_v49 = vld [vmem:[#allocation2 + $0x354] sm:$0xf0]  ;;  %v3218_v39 = vld [vmem:[#allocation2 + $0x1cc] sm:$0xf] }
  0x85   :  { %1623 = vmatpush.bf16.msrb.mxu2 %v2180_v10  ;;  %v3344_v10 = vld [vmem:[#allocation2 + $0x5b4] sm:$0xf0]  ;;  %v2403_v3 = vld [vmem:[#allocation2 + $0x208] sm:$0xf] }
  0x86   :  { %1636 = vmatpush.bf16.msrb.mxu3 %v2308_v14  ;;  %v2467_v14 = vld [vmem:[#allocation2 + $0x288] sm:$0xf]  ;;  %v2868_v17 = vor.u32 %v3344_v10, %v2867_v9  ;;  %v3232_v58 = vld [vmem:[#allocation2 + $0x234] sm:$0xf0] }
  0x87   :  { %1598 = vmatpush.bf16.msrb.mxu0 %v2800_v24  ;;  %v3308_v24 = vld [vmem:[#allocation2 + $0x494] sm:$0xf0]  ;;  %v2531_v7 = vld [vmem:[#allocation2 + $0x308] sm:$0xf] }
  0x88   :  { %1611 = vmatpush.bf16.msrb.mxu1 %v2928_v27  ;;  %v2468_v27 = vor.u32 %v3244_v15, %v2467_v14  ;;  %v2724_v29 = vor.u32 %v3308_v24, %v2723_v23  ;;  %v3264_v61 = vld [vmem:[#allocation2 + $0x334] sm:$0xf0]  ;;  %v2659_v9 = vld [vmem:[#allocation2 + $0x408] sm:$0xf]  ;;  %v3222_v23 = vld [vmem:[#allocation2 + $0x1ec] sm:$0xf] }
  0x89   :  { %1624 = vmatpush.bf16.msrb.mxu2 %v2164_v28  ;;  %v2596_v28 = vor.u32 %v3276_v21, %v2595_v16  ;;  %v3228_v4 = vld [vmem:[#allocation2 + $0x214] sm:$0xf0]  ;;  %v3027_v14 = vld [vmem:[#allocation2 + $0x6e8] sm:$0xf]  ;;  %v3190_v16 = vld [vmem:[#allocation2 + $0xec] sm:$0xf] }
  0x8a   :  { %1637 = vmatpush.bf16.msrb.mxu3 %v2292_v32  ;;  %v2579_v32 = vld [vmem:[#allocation2 + $0x368] sm:$0xf]  ;;  %v3260_v8 = vld [vmem:[#allocation2 + $0x314] sm:$0xf0]  ;;  %v2261_v21 = vld [vmem:[#allocation2 + $0xf8] sm:$0xf0] }
  0x8b   :  { %1599 = vmatpush.bf16.msrb.mxu0 %v2784_v42  ;;  %v2452_v42 = vor.u32 %v3240_v31, %v2451_v30  ;;  %v2580_v43 = vor.u32 %v3272_v34, %v2579_v32  ;;  %v3384_v15 = vld [vmem:[#allocation2 + $0x6f4] sm:$0xf0]  ;;  %v2389_v24 = vld [vmem:[#allocation2 + $0x1f8] sm:$0xf0]  ;;  %v2532_v25 = vor.u32 %v3260_v8, %v2531_v7  ;;  %v2264_v31 = vor.u32 %v3190_v16, %v2261_v21  ;;  %v2963_v8 = vld [vmem:[#allocation2 + $0x668] sm:$0xf] }
  0x8c   :  { %1612 = vmatpush.bf16.msrb.mxu1 %v2912_v46  ;;  %v3236_v46 = vld [vmem:[#allocation2 + $0x254] sm:$0xf0]  ;;  %v3028_v30 = vor.u32 %v3384_v15, %v3027_v14  ;;  %v2392_v32 = vor.u32 %v3222_v23, %v2389_v24  ;;  %v2325_v14 = vld [vmem:[#allocation2 + $0x178] sm:$0xf0]  ;;  %v3238_v15 = vld [vmem:[#allocation2 + $0x26c] sm:$0xf] }
  0x8d   :  { %1625 = vmatpush.bf16.msrb.mxu2 %v2148_v47  ;;  %v2563_v47 = vld [vmem:[#allocation2 + $0x348] sm:$0xf]  ;;  %v2436_v54 = vor.u32 %v3236_v46, %v2435_v45  ;;  %v3380_v34 = vld [vmem:[#allocation2 + $0x6d4] sm:$0xf0]  ;;  %v2248_v46 = vor.u32 %v3186_v35, %v2245_v38  ;;  %v2453_v16 = vld [vmem:[#allocation2 + $0x278] sm:$0xf0] }
  0x8e   :  { %1638 = vmatpush.bf16.msrb.mxu3 %v2276_v50  ;;  %1600 = vmatmul.bf16.vlgmr.msrb.gmra.mxu0 %v3574_v41  ;;  %v2691_v50 = vld [vmem:[#allocation2 + $0x448] sm:$0xf]  ;;  %v2564_v55 = vor.u32 %v3268_v49, %v2563_v47  ;;  %v3376_v49 = vld [vmem:[#allocation2 + $0x6b4] sm:$0xf0] }
  0x8f   :  { %1644 = vmatpush.bf16.msra.mxu0 %v2516_v51  ;;  %1613 = vmatmul.bf16.vlgmr.msrb.gmra.mxu1 %v3570_v37  ;;  %v3300_v51 = vld [vmem:[#allocation2 + $0x454] sm:$0xf0]  ;;  %v2947_v24 = vld [vmem:[#allocation2 + $0x648] sm:$0xf] }
  0x90   :  { %1657 = vmatpush.bf16.msra.mxu1 %v2644_v52  ;;  %1626 = vmatmul.bf16.vlgmr.msrb.gmra.mxu2 %v3554_v19  ;;  %v2819_v52 = vld [vmem:[#allocation2 + $0x548] sm:$0xf]  ;;  %v2692_v56 = vor.u32 %v3300_v51, %v2691_v50  ;;  %v3182_v50 = vld [vmem:[#allocation2 + $0xac] sm:$0xf] }
  0x91   :  { %1670 = vmatpush.bf16.msra.mxu2 %v2772_v53  ;;  %1639 = vmatmul.bf16.vlgmr.msrb.gmra.mxu3 %v3558_v22  ;;  %v3332_v53 = vld [vmem:[#allocation2 + $0x554] sm:$0xf0]  ;;  %v2931_v38 = vld [vmem:[#allocation2 + $0x628] sm:$0xf] }
  0x92   :  { %1683 = vmatpush.bf16.msra.mxu3 %v2900_v57  ;;  %v2419_v57 = vld [vmem:[#allocation2 + $0x228] sm:$0xf]  ;;  %v2820_v60 = vor.u32 %v3332_v53, %v2819_v52  ;;  %v2229_v52 = vld [vmem:[#allocation2 + $0xb8] sm:$0xf0]  ;;  %v3214_v53 = vld [vmem:[#allocation2 + $0x1ac] sm:$0xf] }
  0x93   :  { %1645 = vmatpush.bf16.msra.mxu0 %v2500_v63  ;;  %v3296_v63 = vld [vmem:[#allocation2 + $0x434] sm:$0xf0]  ;;  %v2420_v2 = vor.u32 %v3232_v58, %v2419_v57  ;;  %v2232_v58 = vor.u32 %v3182_v50, %v2229_v52 }
  0x94   :  { %1658 = vmatpush.bf16.msra.mxu1 %v2628_v0  ;;  %v2803_v0 = vld [vmem:[#allocation2 + $0x528] sm:$0xf]  ;;  %v2676_v6 = vor.u32 %v3296_v63, %v2675_v62  ;;  %v3178_v62 = vld [vmem:[#allocation2 + $0x8c] sm:$0xf]  ;;  %v3356_v52 = vld [vmem:[#allocation2 + $0x614] sm:$0xf0] }
  0x95   :  { %1671 = vmatpush.bf16.msra.mxu2 %v2756_v1  ;;  %v3328_v1 = vld [vmem:[#allocation2 + $0x534] sm:$0xf0] }
  0x96   :  { %1684 = vmatpush.bf16.msra.mxu3 %v2884_v5  ;;  %v2548_v5 = vor.u32 %v3264_v61, %v2547_v59  ;;  %v2804_v10 = vor.u32 %v3328_v1, %v2803_v0  ;;  %v3372_v61 = vld [vmem:[#allocation2 + $0x694] sm:$0xf0]  ;;  %v2213_v0 = vld [vmem:[#allocation2 + $0x98] sm:$0xf0]  ;;  %v3210_v1 = vld [vmem:[#allocation2 + $0x18c] sm:$0xf] }
  0x97   :  { %1646 = vmatpush.bf16.msra.mxu0 %v2484_v11  ;;  %v3292_v11 = vld [vmem:[#allocation2 + $0x414] sm:$0xf0] }
  0x98   :  { %1659 = vmatpush.bf16.msra.mxu1 %v2612_v12  ;;  %v2787_v12 = vld [vmem:[#allocation2 + $0x508] sm:$0xf]  ;;  %v2660_v26 = vor.u32 %v3292_v11, %v2659_v9  ;;  %v3368_v9 = vld [vmem:[#allocation2 + $0x674] sm:$0xf0] }
  0x99   :  { %1672 = vmatpush.bf16.msra.mxu2 %v2740_v13  ;;  %v3324_v13 = vld [vmem:[#allocation2 + $0x514] sm:$0xf0] }
  0x9a   :  { %1685 = vmatpush.bf16.msra.mxu3 %v2868_v17  ;;  %v2404_v17 = vor.u32 %v3228_v4, %v2403_v3  ;;  %v3242_v3 = vld [vmem:[#allocation2 + $0x28c] sm:$0xf]  ;;  %v2469_v4 = vld [vmem:[#allocation2 + $0x298] sm:$0xf0] }
  0x9b   :  { %1647 = vmatpush.bf16.msra.mxu0 %v2468_v27  ;;  %v3254_v27 = vld [vmem:[#allocation2 + $0x2ec] sm:$0xf]  ;;  %v2472_v11 = vor.u32 %v3242_v3, %v2469_v4  ;;  %v2773_v4 = vld [vmem:[#allocation2 + $0x4f8] sm:$0xf0] }
  0x9c   :  { %1660 = vmatpush.bf16.msra.mxu1 %v2596_v28  ;;  %v2517_v28 = vld [vmem:[#allocation2 + $0x2f8] sm:$0xf0] }
  0x9d   :  { %1673 = vmatpush.bf16.msra.mxu2 %v2724_v29  ;;  %v2788_v29 = vor.u32 %v3324_v13, %v2787_v12  ;;  %v2520_v36 = vor.u32 %v3254_v27, %v2517_v28  ;;  %v2197_v12 = vld [vmem:[#allocation2 + $0x78] sm:$0xf0]  ;;  %v3206_v13 = vld [vmem:[#allocation2 + $0x16c] sm:$0xf]  ;;  %v2456_v27 = vor.u32 %v3238_v15, %v2453_v16 }
  0x9e   :  { %1686 = vmatpush.bf16.msra.mxu3 %v2852_v33  ;;  %v3011_v33 = vld [vmem:[#allocation2 + $0x6c8] sm:$0xf]  ;;  %v2328_v23 = vor.u32 %v3206_v13, %v2325_v14  ;;  %v2181_v28 = vld [vmem:[#allocation2 + $0x58] sm:$0xf0] }
  0x9f   :  { %1648 = vmatpush.bf16.msra.mxu0 %v2452_v42  ;;  %v2373_v42 = vld [vmem:[#allocation2 + $0x1d8] sm:$0xf0]  ;;  %v3012_v45 = vor.u32 %v3380_v34, %v3011_v33 }
  0xa0   :  { %1661 = vmatpush.bf16.msra.mxu1 %v2580_v43  ;;  %v3250_v43 = vld [vmem:[#allocation2 + $0x2cc] sm:$0xf]  ;;  %v2376_v47 = vor.u32 %v3218_v39, %v2373_v42  ;;  %v3360_v39 = vld [vmem:[#allocation2 + $0x634] sm:$0xf0] }
  0xa1   :  { %1674 = vmatpush.bf16.msra.mxu2 %v2708_v44  ;;  %v2501_v44 = vld [vmem:[#allocation2 + $0x2d8] sm:$0xf0]  ;;  %v3166_v42 = vld [vmem:[#allocation2 + $0x2c] sm:$0xf]  ;;  %v2932_v50 = vor.u32 %v3360_v39, %v2931_v38 }
  0xa2   :  { %1687 = vmatpush.bf16.msra.mxu3 %v2836_v48  ;;  %v2995_v48 = vld [vmem:[#allocation2 + $0x6a8] sm:$0xf]  ;;  %v2504_v51 = vor.u32 %v3250_v43, %v2501_v44  ;;  %v2613_v38 = vld [vmem:[#allocation2 + $0x3b8] sm:$0xf0]  ;;  %v3310_v39 = vld [vmem:[#allocation2 + $0x4ac] sm:$0xf] }
  0xa3   :  { %1649 = vmatpush.bf16.msra.mxu0 %v2436_v54  ;;  %v2357_v54 = vld [vmem:[#allocation2 + $0x1b8] sm:$0xf0]  ;;  %v2996_v57 = vor.u32 %v3376_v49, %v2995_v48  ;;  %v3230_v48 = vld [vmem:[#allocation2 + $0x22c] sm:$0xf] }
  0xa4   :  { %1662 = vmatpush.bf16.msra.mxu1 %v2564_v55  ;;  %v3246_v55 = vld [vmem:[#allocation2 + $0x2ac] sm:$0xf]  ;;  %v2360_v59 = vor.u32 %v3214_v53, %v2357_v54  ;;  %v2421_v49 = vld [vmem:[#allocation2 + $0x238] sm:$0xf0] }
  0xa5   :  { %1675 = vmatpush.bf16.msra.mxu2 %v2692_v56  ;;  %v2485_v56 = vld [vmem:[#allocation2 + $0x2b8] sm:$0xf0] }
  0xa6   :  { %1688 = vmatpush.bf16.msra.mxu3 %v2820_v60  ;;  %v2979_v60 = vld [vmem:[#allocation2 + $0x688] sm:$0xf]  ;;  %v2488_v63 = vor.u32 %v3246_v55, %v2485_v56  ;;  %v3162_v55 = vld [vmem:[#allocation2 + $0xc] sm:$0xf]  ;;  %v2149_v56 = vld [vmem:[#allocation2 + $0x18] sm:$0xf0] }
  0xa7   :  { %1650 = vmatpush.bf16.msra.mxu0 %v2420_v2  ;;  %v2341_v2 = vld [vmem:[#allocation2 + $0x198] sm:$0xf0] }
  0xa8   :  { %1663 = vmatpush.bf16.msra.mxu1 %v2548_v5  ;;  %v2980_v5 = vor.u32 %v3372_v61, %v2979_v60  ;;  %v2344_v7 = vor.u32 %v3210_v1, %v2341_v2  ;;  %v2277_v60 = vld [vmem:[#allocation2 + $0x118] sm:$0xf0]  ;;  %v3226_v61 = vld [vmem:[#allocation2 + $0x20c] sm:$0xf] }
  0xa9   :  { %1676 = vmatpush.bf16.msra.mxu2 %v2676_v6  ;;  %v2216_v6 = vor.u32 %v3178_v62, %v2213_v0  ;;  %v2405_v62 = vld [vmem:[#allocation2 + $0x218] sm:$0xf0]  ;;  %v3286_v0 = vld [vmem:[#allocation2 + $0x3ec] sm:$0xf] }
  0xaa   :  { %1689 = vmatpush.bf16.msra.mxu3 %v2804_v10  ;;  %v3174_v10 = vld [vmem:[#allocation2 + $0x6c] sm:$0xf]  ;;  %v2645_v1 = vld [vmem:[#allocation2 + $0x3f8] sm:$0xf0]  ;;  %v2408_v13 = vor.u32 %v3226_v61, %v2405_v62 }
  0xab   :  { %1651 = vmatpush.bf16.msra.mxu0 %v2404_v17  ;;  %v2964_v17 = vor.u32 %v3368_v9, %v2963_v8  ;;  %v2200_v21 = vor.u32 %v3174_v10, %v2197_v12  ;;  %v3318_v2 = vld [vmem:[#allocation2 + $0x4ec] sm:$0xf]  ;;  %v2152_v8 = vor.u32 %v3162_v55, %v2149_v56  ;;  %v2648_v14 = vor.u32 %v3286_v0, %v2645_v1  ;;  %v2725_v56 = vld [vmem:[#allocation2 + $0x498] sm:$0xf0] }
  0xac   :  { %1664 = vmatpush.bf16.msra.mxu1 %v2532_v25  ;;  %v3364_v25 = vld [vmem:[#allocation2 + $0x654] sm:$0xf0]  ;;  %v3382_v10 = vld [vmem:[#allocation2 + $0x6ec] sm:$0xf]  ;;  %v2776_v15 = vor.u32 %v3318_v2, %v2773_v4  ;;  %v2581_v2 = vld [vmem:[#allocation2 + $0x378] sm:$0xf0] }
  0xad   :  { %1677 = vmatpush.bf16.msra.mxu2 %v2660_v26  ;;  %v3170_v26 = vld [vmem:[#allocation2 + $0x4c] sm:$0xf]  ;;  %v2948_v33 = vor.u32 %v3364_v25, %v2947_v24  ;;  %v2757_v25 = vld [vmem:[#allocation2 + $0x4d8] sm:$0xf0] }
  0xae   :  { %1690 = vmatpush.bf16.msra.mxu3 %v2788_v29  ;;  %1652 = vmatmul.bf16.vlgmr.msra.gmra.mxu0 %v3552_v18  ;;  %v3202_v29 = vld [vmem:[#allocation2 + $0x14c] sm:$0xf]  ;;  %v2184_v35 = vor.u32 %v3170_v26, %v2181_v28 }
  0xaf   :  { %1696 = vmatpush.bf16.msrb.mxu0 %v3028_v30  ;;  %1665 = vmatmul.bf16.vlgmr.msra.gmra.mxu1 %v3556_v20  ;;  %v2309_v30 = vld [vmem:[#allocation2 + $0x158] sm:$0xf0]  ;;  %v3346_v26 = vld [vmem:[#allocation2 + $0x5cc] sm:$0xf] }
  0xb0   :  { %1709 = vmatpush.bf16.msrb.mxu1 %v2264_v31  ;;  %1678 = vmatmul.bf16.vlgmr.msra.gmra.mxu2 %v3572_v40  ;;  %v3234_v31 = vld [vmem:[#allocation2 + $0x24c] sm:$0xf] }
  0xb1   :  { %1722 = vmatpush.bf16.msrb.mxu2 %v2392_v32  ;;  %1691 = vmatmul.bf16.vlgmr.msra.gmra.mxu3 %v3574_v41  ;;  %v2437_v32 = vld [vmem:[#allocation2 + $0x258] sm:$0xf0]  ;;  %v3378_v28 = vld [vmem:[#allocation2 + $0x6cc] sm:$0xf] }
  0xb2   :  { %1735 = vmatpush.bf16.msrb.mxu3 %v2520_v36  ;;  %v2312_v36 = vor.u32 %v3202_v29, %v2309_v30  ;;  %v2440_v44 = vor.u32 %v3234_v31, %v2437_v32  ;;  %v3013_v29 = vld [vmem:[#allocation2 + $0x6d8] sm:$0xf0]  ;;  %v3270_v1 = vld [vmem:[#allocation2 + $0x36c] sm:$0xf] }
  0xb3   :  { %1697 = vmatpush.bf16.msrb.mxu0 %v3012_v45  ;;  %v2165_v45 = vld [vmem:[#allocation2 + $0x38] sm:$0xf0] }
  0xb4   :  { %1710 = vmatpush.bf16.msrb.mxu1 %v2248_v46  ;;  %v3198_v46 = vld [vmem:[#allocation2 + $0x12c] sm:$0xf]  ;;  %v2168_v53 = vor.u32 %v3166_v42, %v2165_v45  ;;  %v3016_v42 = vor.u32 %v3378_v28, %v3013_v29 }
  0xb5   :  { %1723 = vmatpush.bf16.msrb.mxu2 %v2376_v47  ;;  %v2293_v47 = vld [vmem:[#allocation2 + $0x138] sm:$0xf0]  ;;  %v3342_v45 = vld [vmem:[#allocation2 + $0x5ac] sm:$0xf] }
  0xb6   :  { %1736 = vmatpush.bf16.msrb.mxu3 %v2504_v51  ;;  %v2915_v51 = vld [vmem:[#allocation2 + $0x608] sm:$0xf]  ;;  %v2296_v54 = vor.u32 %v3198_v46, %v2293_v47  ;;  %v2869_v46 = vld [vmem:[#allocation2 + $0x5b8] sm:$0xf0]  ;;  %v3374_v47 = vld [vmem:[#allocation2 + $0x6ac] sm:$0xf] }
  0xb7   :  { %1698 = vmatpush.bf16.msrb.mxu0 %v2996_v57  ;;  %v3592_v34 = vpop.f32.mrf.mxu0  ;;  %v3194_v57 = vld [vmem:[#allocation2 + $0x10c] sm:$0xf]  ;;  %v2916_v3 = vor.u32 %v3356_v52, %v2915_v51  ;;  %v2872_v51 = vor.u32 %v3342_v45, %v2869_v46  ;;  %v2933_v46 = vld [vmem:[#allocation2 + $0x638] sm:$0xf0] }
  0xb8   :  { %1711 = vmatpush.bf16.msrb.mxu1 %v2232_v58  ;;  %v3594_v43 = vpop.f32.mrf.mxu1  ;;  %v3596_v58 = vpop.f32.mrf.mxu2  ;;  %v2280_v9 = vor.u32 %v3194_v57, %v2277_v60  ;;  %v3274_v52 = vld [vmem:[#allocation2 + $0x38c] sm:$0xf]  ;;  %v2981_v60 = vld [vmem:[#allocation2 + $0x698] sm:$0xf0] }
  0xb9   :  { %1724 = vmatpush.bf16.msrb.mxu2 %v2360_v59  ;;  %v2424_v59 = vor.u32 %v3230_v48, %v2421_v49  ;;  %v2997_v48 = vld [vmem:[#allocation2 + $0x6b8] sm:$0xf0]  ;;  %v3338_v57 = vld [vmem:[#allocation2 + $0x58c] sm:$0xf] }
  0xba   :  { %1737 = vmatpush.bf16.msrb.mxu3 %v2488_v63  ;;  %v3598_v63 = vpop.f32.mrf.mxu3  ;;  %v3000_v55 = vor.u32 %v3374_v47, %v2997_v48  ;;  %v3358_v45 = vld [vmem:[#allocation2 + $0x62c] sm:$0xf]  ;;  %v3615_v47 = vld [vmem:[%s3641_s2] ss:$8 sm:$0xf] }
  0xbb   :  { %1699 = vmatpush.bf16.msrb.mxu0 %v2980_v5  ;;  %v3350_v5 = vld [vmem:[#allocation2 + $0x5ec] sm:$0xf] }
  0xbc   :  { %1712 = vmatpush.bf16.msrb.mxu1 %v2216_v6  ;;  %v2901_v6 = vld [vmem:[#allocation2 + $0x5f8] sm:$0xf0] }
  0xbd   :  { %1725 = vmatpush.bf16.msrb.mxu2 %v2344_v7  ;;  %v2904_v16 = vor.u32 %v3350_v5, %v2901_v6  ;;  %v2709_v5 = vld [vmem:[#allocation2 + $0x478] sm:$0xf0]  ;;  %v3334_v6 = vld [vmem:[#allocation2 + $0x56c] sm:$0xf] }
  0xbe   :  { %1738 = vmatpush.bf16.msrb.mxu3 %v2472_v11  ;;  %v3029_v11 = vld [vmem:[#allocation2 + $0x6f8] sm:$0xf0] }
  0xbf   :  { %1700 = vmatpush.bf16.msrb.mxu0 %v2964_v17  ;;  %v1447_v7 = vpop.f32.mrf.mxu0  ;;  %v3282_v17 = vld [vmem:[#allocation2 + $0x3cc] sm:$0xf]  ;;  %v3032_v24 = vor.u32 %v3382_v10, %v3029_v11  ;;  %v2584_v10 = vor.u32 %v3270_v1, %v2581_v2 }
  0xc0   :  { %1713 = vmatpush.bf16.msrb.mxu1 %v2200_v21  ;;  %v1460_v12 = vpop.f32.mrf.mxu1  ;;  %v2629_v21 = vld [vmem:[#allocation2 + $0x3d8] sm:$0xf0]  ;;  %v1473_v30 = vpop.f32.mrf.mxu2 }
  0xc1   :  { %1726 = vmatpush.bf16.msrb.mxu2 %v2328_v23  ;;  %v3314_v23 = vld [vmem:[#allocation2 + $0x4cc] sm:$0xf]  ;;  %v2632_v31 = vor.u32 %v3282_v17, %v2629_v21  ;;  %v2837_v7 = vld [vmem:[#allocation2 + $0x578] sm:$0xf0] }
  0xc2   :  { %1739 = vmatpush.bf16.msrb.mxu3 %v2456_v27  ;;  %v2885_v27 = vld [vmem:[#allocation2 + $0x5d8] sm:$0xf0]  ;;  %v1486_v32 = vpop.f32.mrf.mxu3  ;;  %v2840_v12 = vor.u32 %v3334_v6, %v2837_v7  ;;  %v3391_v7 = vld [vmem:[#allocation5 + $0x30] sm:$0xff] }
  0xc3   :  { %1701 = vmatpush.bf16.msrb.mxu0 %v2948_v33  ;;  %v2760_v33 = vor.u32 %v3314_v23, %v2757_v25  ;;  %v2693_v21 = vld [vmem:[#allocation2 + $0x458] sm:$0xf0]  ;;  %v3330_v23 = vld [vmem:[#allocation2 + $0x54c] sm:$0xf] }
  0xc4   :  { %1714 = vmatpush.bf16.msrb.mxu1 %v2184_v35  ;;  %v2888_v35 = vor.u32 %v3346_v26, %v2885_v27  ;;  %v3362_v25 = vld [vmem:[#allocation2 + $0x64c] sm:$0xf]  ;;  %v2949_v26 = vld [vmem:[#allocation2 + $0x658] sm:$0xf0] }
  0xc5   :  { %1727 = vmatpush.bf16.msrb.mxu2 %v2312_v36  ;;  %v3278_v36 = vld [vmem:[#allocation2 + $0x3ac] sm:$0xf]  ;;  %v3400_v6 = vld [vmem:[#allocation5 + $0x78] sm:$0xff] }
  0xc6   :  { %1740 = vmatpush.bf16.msrb.mxu3 %v2440_v44  ;;  %v2741_v44 = vld [vmem:[#allocation2 + $0x4b8] sm:$0xf0]  ;;  %v2616_v49 = vor.u32 %v3278_v36, %v2613_v38  ;;  %v3294_v36 = vld [vmem:[#allocation2 + $0x42c] sm:$0xf]  ;;  %v2952_v38 = vor.u32 %v3362_v25, %v2949_v26 }
  0xc7   :  { %1702 = vmatpush.bf16.msrb.mxu0 %v2932_v50  ;;  %v2744_v50 = vor.u32 %v3310_v39, %v2741_v44  ;;  %v2677_v39 = vld [vmem:[#allocation2 + $0x438] sm:$0xf0] }
  0xc8   :  { %1715 = vmatpush.bf16.msrb.mxu1 %v2168_v53  ;;  %v2597_v53 = vld [vmem:[#allocation2 + $0x398] sm:$0xf0] }
  0xc9   :  { %1728 = vmatpush.bf16.msrb.mxu2 %v2296_v54  ;;  %v3306_v54 = vld [vmem:[#allocation2 + $0x48c] sm:$0xf]  ;;  %v2805_v44 = vld [vmem:[#allocation2 + $0x538] sm:$0xf0] }
  0xca   :  { %1741 = vmatpush.bf16.msrb.mxu3 %v2424_v59  ;;  %v3370_v59 = vld [vmem:[#allocation2 + $0x68c] sm:$0xf] }
  0xcb   :  { %1703 = vmatpush.bf16.msrb.mxu0 %v2916_v3  ;;  %v3604_v61 = vpop.f32.mrf.mxu0  ;;  %v3302_v3 = vld [vmem:[#allocation2 + $0x46c] sm:$0xf]  ;;  %v2984_v4 = vor.u32 %v3370_v59, %v2981_v60  ;;  %v283_v59 = vperm.slane %v3615_v47, 0 }
  0xcc   :  { %1716 = vmatpush.bf16.msrb.mxu1 %v2152_v8  ;;  %v3606_v62 = vpop.f32.mrf.mxu1  ;;  %v3366_v8 = vld [vmem:[#allocation2 + $0x66c] sm:$0xf]  ;;  %v2712_v11 = vor.u32 %v3302_v3, %v2709_v5 }
  0xcd   :  { %1729 = vmatpush.bf16.msrb.mxu2 %v2280_v9  ;;  %v2965_v9 = vld [vmem:[#allocation2 + $0x678] sm:$0xf0]  ;;  %v3354_v60 = vld [vmem:[#allocation2 + $0x60c] sm:$0xf]  ;;  %v1446_v5 = vadd.f32 %v3592_v34, %v283_v59  ;;  %v3403_v59 = vld [vmem:[#allocation5 + $0x90] sm:$0xff] }
  0xce   :  { %1742 = vmatpush.bf16.msrb.mxu3 %v2408_v13  ;;  %1704 = vmatmul.bf16.vlgmr.msrb.gmra.mxu0 %v3570_v37  ;;  %v3266_v13 = vld [vmem:[#allocation2 + $0x34c] sm:$0xf]  ;;  %v2968_v17 = vor.u32 %v3366_v8, %v2965_v9  ;;  %v3399_v9 = vld [vmem:[#allocation5 + $0x70] sm:$0xff] }
  0xcf   :  { %1748 = vmatpush.bf16.msra.mxu0 %v2648_v14  ;;  %1717 = vmatmul.bf16.vlgmr.msrb.gmra.mxu1 %v3554_v19  ;;  %v2728_v19 = vor.u32 %v3306_v54, %v2725_v56  ;;  %v2565_v14 = vld [vmem:[#allocation2 + $0x358] sm:$0xf0]  ;;  %v1459_v8 = vadd.f32 %v3594_v43, %v1446_v5  ;;  %v3390_v34 = vld [vmem:[#allocation5 + $0x28] sm:$0xff] }
  0xd0   :  { %1761 = vmatpush.bf16.msra.mxu1 %v2776_v15  ;;  %1730 = vmatmul.bf16.vlgmr.msrb.gmra.mxu2 %v3558_v22  ;;  %v2853_v22 = vld [vmem:[#allocation2 + $0x598] sm:$0xf0]  ;;  %v3298_v15 = vld [vmem:[#allocation2 + $0x44c] sm:$0xf]  ;;  %v2568_v28 = vor.u32 %v3266_v13, %v2565_v14  ;;  %v3397_v14 = vld [vmem:[#allocation5 + $0x60] sm:$0xff] }
  0xd1   :  { %1774 = vmatpush.bf16.msra.mxu2 %v2904_v16  ;;  %1743 = vmatmul.bf16.vlgmr.msrb.gmra.mxu3 %v3552_v18  ;;  %v2600_v18 = vor.u32 %v3274_v52, %v2597_v53  ;;  %v2856_v0 = vor.u32 %v3338_v57, %v2853_v22  ;;  %v2533_v52 = vld [vmem:[#allocation2 + $0x318] sm:$0xf0]  ;;  %v3290_v53 = vld [vmem:[#allocation2 + $0x40c] sm:$0xf] }
  0xd2   :  { %1787 = vmatpush.bf16.msra.mxu3 %v3032_v24  ;;  %v2821_v24 = vld [vmem:[#allocation2 + $0x558] sm:$0xf0]  ;;  %v3322_v57 = vld [vmem:[#allocation2 + $0x50c] sm:$0xf] }
  0xd3   :  { %1749 = vmatpush.bf16.msra.mxu0 %v2632_v31  ;;  %v3608_v16 = vpop.f32.mrf.mxu2  ;;  %v1499_v29 = vpop.f32.mrf.mxu0  ;;  %v2696_v31 = vor.u32 %v3298_v15, %v2693_v21  ;;  %v2824_v32 = vor.u32 %v3330_v23, %v2821_v24  ;;  %v2661_v56 = vld [vmem:[#allocation2 + $0x418] sm:$0xf0]  ;;  %v3387_v21 = vld [vmem:[#allocation5 + $0x10] sm:$0xff] }
  0xd4   :  { %1762 = vmatpush.bf16.msra.mxu1 %v2760_v33  ;;  %v3610_v27 = vpop.f32.mrf.mxu3  ;;  %v1512_v30 = vpop.f32.mrf.mxu1  ;;  %v3262_v33 = vld [vmem:[#allocation2 + $0x32c] sm:$0xf]  ;;  %v2789_v22 = vld [vmem:[#allocation2 + $0x518] sm:$0xf0]  ;;  %v2664_v1 = vor.u32 %v3290_v53, %v2661_v56  ;;  %v3405_v53 = vld [vmem:[#allocation5 + $0xa0] sm:$0xff] }
  0xd5   :  { %1775 = vmatpush.bf16.msra.mxu2 %v2888_v35  ;;  %v2549_v35 = vld [vmem:[#allocation2 + $0x338] sm:$0xf0]  ;;  %v2792_v2 = vor.u32 %v3322_v57, %v2789_v22  ;;  %v3394_v30 = vld [vmem:[#allocation5 + $0x48] sm:$0xff] }
  0xd6   :  { %1788 = vmatpush.bf16.msra.mxu3 %v3016_v42  ;;  %v3326_v42 = vld [vmem:[#allocation2 + $0x52c] sm:$0xf]  ;;  %v2552_v48 = vor.u32 %v3262_v33, %v2549_v35  ;;  %v3408_v29 = vld [vmem:[#allocation5 + $0xb8] sm:$0xff]  ;;  %v3385_v35 = vld [vmem:[#allocation5] sm:$0xff] }
  0xd7   :  { %1750 = vmatpush.bf16.msra.mxu0 %v2616_v49  ;;  %v2680_v49 = vor.u32 %v3294_v36, %v2677_v39  ;;  %v3404_v57 = vld [vmem:[#allocation5 + $0x98] sm:$0xff] }
  0xd8   :  { %1763 = vmatpush.bf16.msra.mxu1 %v2744_v50  ;;  %v2808_v50 = vor.u32 %v3326_v42, %v2805_v44  ;;  %v3416_v5 = vld [vmem:[#allocation5 + $0xf8] sm:$0xff] }
  0xd9   :  { %1776 = vmatpush.bf16.msra.mxu2 %v2872_v51  ;;  %v3258_v51 = vld [vmem:[#allocation2 + $0x30c] sm:$0xf] }
  0xda   :  { %1789 = vmatpush.bf16.msra.mxu3 %v3000_v55  ;;  %v2936_v55 = vor.u32 %v3358_v45, %v2933_v46 }
  0xdb   :  { %1751 = vmatpush.bf16.msra.mxu0 %v2600_v18  ;;  %v1525_v54 = vpop.f32.mrf.mxu2  ;;  %v2917_v18 = vld [vmem:[#allocation2 + $0x618] sm:$0xf0] }
  0xdc   :  { %1764 = vmatpush.bf16.msra.mxu1 %v2728_v19  ;;  %v1538_v19 = vpop.f32.mrf.mxu3  ;;  %v2920_v3 = vor.u32 %v3354_v60, %v2917_v18  ;;  %v3402_v18 = vld [vmem:[#allocation5 + $0x88] sm:$0xff] }
  0xdd   :  { %1777 = vmatpush.bf16.msra.mxu2 %v2856_v0  ;;  %v2536_v0 = vor.u32 %v3258_v51, %v2533_v52 }
  0xde   :  { %1790 = vmatpush.bf16.msra.mxu3 %v2984_v4  ;;  %v3392_v4 = vld [vmem:[#allocation5 + $0x38] sm:$0xff] }
  0xdf   :  { %1752 = vmatpush.bf16.msra.mxu0 %v2584_v10  ;;  %v1472_v10 = vadd.f32 %v3596_v58, %v1459_v8  ;;  %v284_v58 = vperm.slane %v3615_v47, 1 }
  0xe0   :  { %1765 = vmatpush.bf16.msra.mxu1 %v2712_v11  ;;  %v3398_v11 = vld [vmem:[#allocation5 + $0x68] sm:$0xff] }
  0xe1   :  { %1778 = vmatpush.bf16.msra.mxu2 %v2840_v12  ;;  %v3389_v12 = vld [vmem:[#allocation5 + $0x20] sm:$0xff]  ;;  %v1485_v43 = vadd.f32 %v3598_v63, %v1472_v10  ;;  %v3395_v63 = vld [vmem:[#allocation5 + $0x50] sm:$0xff]  ;;  %v1537_v26 = vadd.f32 %v3610_v27, %v284_v58 }
  0xe2   :  { %1791 = vmatpush.bf16.msra.mxu3 %v2968_v17 }
  0xe3   :  { %1753 = vmatpush.bf16.msra.mxu0 %v2568_v28  ;;  %v3386_v28 = vld [vmem:[#allocation5 + $0x8] sm:$0xff] }
  0xe4   :  { %1766 = vmatpush.bf16.msra.mxu1 %v2696_v31 }
  0xe5   :  { %1779 = vmatpush.bf16.msra.mxu2 %v2824_v32 }
  0xe6   :  { %1792 = vmatpush.bf16.msra.mxu3 %v2952_v38 }
  0xe7   :  { %1754 = vmatpush.bf16.msra.mxu0 %v2552_v48 }
  0xe8   :  { %1767 = vmatpush.bf16.msra.mxu1 %v2680_v49 }
  0xe9   :  { %1780 = vmatpush.bf16.msra.mxu2 %v2808_v50  ;;  %v3406_v50 = vld [vmem:[#allocation5 + $0xa8] sm:$0xff] }
  0xea   :  { %1793 = vmatpush.bf16.msra.mxu3 %v2936_v55 }
  0xeb   :  { %1755 = vmatpush.bf16.msra.mxu0 %v2536_v0  ;;  %v1549_v13 = vpop.f32.mrf.mxu0 }
  0xec   :  { %1768 = vmatpush.bf16.msra.mxu1 %v2664_v1  ;;  %v1550_v33 = vadd.f32 %v1549_v13, %v1537_v26  ;;  %v3401_v1 = vld [vmem:[#allocation5 + $0x80] sm:$0xff] }
  0xed   :  { %1781 = vmatpush.bf16.msra.mxu2 %v2792_v2  ;;  %v285_v2 = vperm.slane %v3615_v47, 2 }
  0xee   :  { %1794 = vmatpush.bf16.msra.mxu3 %v2920_v3  ;;  %1756 = vmatmul.bf16.vlgmr.msra.gmra.mxu0 %v3556_v20  ;;  %v1562_v20 = vpop.f32.mrf.mxu1 }
  0xef   :  { %2066 = vmatpush.bf16.msrb.mxu0 %v3392_v4  ;;  %1769 = vmatmul.bf16.vlgmr.msra.gmra.mxu1 %v3572_v40  ;;  %v3388_v40 = vld [vmem:[#allocation5 + $0x18] sm:$0xff]  ;;  %v1563_v38 = vadd.f32 %v1562_v20, %v1550_v33 }
  0xf0   :  { %2079 = vmatpush.bf16.msrb.mxu1 %v3400_v6  ;;  %1782 = vmatmul.bf16.vlgmr.msra.gmra.mxu2 %v3574_v41  ;;  %v1498_v41 = vadd.f32 %v3604_v61, %v1485_v43  ;;  %v3413_v43 = vld [vmem:[#allocation5 + $0xe0] sm:$0xff] }
  0xf1   :  { %1795 = vmatmul.bf16.vlgmr.msra.gmra.mxu3 %v3570_v37  ;;  %v3396_v37 = vld [vmem:[#allocation5 + $0x58] sm:$0xff]  ;;  %2092 = vmatpush.bf16.msrb.mxu2 %v3408_v29 }
  0xf2   :  { %v1511_v24 = vadd.f32 %v3606_v62, %v1498_v41  ;;  %v3393_v62 = vld [vmem:[#allocation5 + $0x40] sm:$0xff]  ;;  %2105 = vmatpush.bf16.msrb.mxu3 %v3416_v5 }
  0xf3   :  { %2067 = vmatpush.bf16.msrb.mxu0 %v3391_v7  ;;  %v1575_v15 = vpop.f32.mrf.mxu2  ;;  %v1551_v23 = vpop.f32.mrf.mxu0 }
  0xf4   :  { %2080 = vmatpush.bf16.msrb.mxu1 %v3399_v9  ;;  %v1588_v17 = vpop.f32.mrf.mxu3  ;;  %v1524_v61 = vadd.f32 %v3608_v16, %v1511_v24  ;;  %v1576_v27 = vadd.f32 %v1575_v15, %v1563_v38  ;;  %v3407_v16 = vld [vmem:[#allocation5 + $0xb0] sm:$0xff]  ;;  %v3410_v24 = vld [vmem:[#allocation5 + $0xc8] sm:$0xff] }
  0xf5   :  { %2093 = vmatpush.bf16.msrb.mxu2 %v3407_v16  ;;  %v3415_v9 = vld [vmem:[#allocation5 + $0xf0] sm:$0xff] }
  0xf6   :  { %v1564_v25 = vpop.f32.mrf.mxu1  ;;  %v1800_v36 = vmax.f32 %v1524_v61, 0.0  ;;  %v1589_v42 = vadd.f32 %v1588_v17, %v1576_v27  ;;  %2106 = vmatpush.bf16.msrb.mxu3 %v3415_v9 }
  0xf7   :  { %2068 = vmatpush.bf16.msrb.mxu0 %v3390_v34 }
  0xf8   :  { %2081 = vmatpush.bf16.msrb.mxu1 %v3398_v11  ;;  %v1804_v39 = vpack.c.bf16 %v1800_v36, %v1800_v36  ;;  %v3414_v11 = vld [vmem:[#allocation5 + $0xe8] sm:$0xff] }
  0xf9   :  { %2094 = vmatpush.bf16.msrb.mxu2 %v3406_v50 }
  0xfa   :  { %2107 = vmatpush.bf16.msrb.mxu3 %v3414_v11 }
  0xfb   :  { %2069 = vmatpush.bf16.msrb.mxu0 %v3389_v12  ;;  %v1577_v31 = vpop.f32.mrf.mxu2 }
  0xfc   :  { %2082 = vmatpush.bf16.msrb.mxu1 %v3397_v14  ;;  %v1590_v32 = vpop.f32.mrf.mxu3  ;;  %v286_v31 = vperm.slane %v3615_v47, 3 }
  0xfd   :  { %2095 = vmatpush.bf16.msrb.mxu2 %v3405_v53  ;;  %v3424_v53 = vld [vmem:[%s3643_s4] ss:$0 sm:$0xff] }
  0xfe   :  { %2108 = vmatpush.bf16.msrb.mxu3 %v3413_v43 }
  0xff   :  { %2070 = vmatpush.bf16.msrb.mxu0 %v3388_v40  ;;  %v3412_v40 = vld [vmem:[#allocation5 + $0xd8] sm:$0xff] }
 0x100   :  { %2083 = vmatpush.bf16.msrb.mxu1 %v3396_v37  ;;  %v3411_v37 = vld [vmem:[#allocation5 + $0xd0] sm:$0xff] }
 0x101   :  { %2096 = vmatpush.bf16.msrb.mxu2 %v3404_v57 }
 0x102   :  { %2109 = vmatpush.bf16.msrb.mxu3 %v3412_v40 }
 0x103   :  { %2071 = vmatpush.bf16.msrb.mxu0 %v3387_v21 }
 0x104   :  { %2084 = vmatpush.bf16.msrb.mxu1 %v3395_v63 }
 0x105   :  { %2097 = vmatpush.bf16.msrb.mxu2 %v3403_v59 }
 0x106   :  { %2110 = vmatpush.bf16.msrb.mxu3 %v3411_v37 }
 0x107   :  { %2072 = vmatpush.bf16.msrb.mxu0 %v3386_v28  ;;  %v3409_v28 = vld [vmem:[#allocation5 + $0xc0] sm:$0xff] }
 0x108   :  { %2085 = vmatpush.bf16.msrb.mxu1 %v3394_v30 }
 0x109   :  { %2098 = vmatpush.bf16.msrb.mxu2 %v3402_v18 }
 0x10a   :  { %2111 = vmatpush.bf16.msrb.mxu3 %v3410_v24 }
 0x10b   :  { %2073 = vmatpush.bf16.msrb.mxu0 %v3385_v35  ;;  %v1601_v44 = vpop.f32.mrf.mxu0 }
 0x10c   :  { %2086 = vmatpush.bf16.msrb.mxu1 %v3393_v62  ;;  %v1602_v45 = vadd.f32 %v1601_v44, %v1589_v42  ;;  %v1614_v46 = vpop.f32.mrf.mxu1 }
 0x10d   :  { %2099 = vmatpush.bf16.msrb.mxu2 %v3401_v1 }
 0x10e   :  { %2074 = vmatmul.bf16.vlgmr.msrb.gmra.mxu0 %v1804_v39  ;;  %v1615_v48 = vadd.f32 %v1614_v46, %v1602_v45  ;;  %2112 = vmatpush.bf16.msrb.mxu3 %v3409_v28 }
 0x110   :  { %v1801_v49 = vmax.f32 %v1615_v48, 0.0 }
 0x112   :  { %v1805_v51 = vpack.c.bf16 %v1801_v49, %v1801_v49 }
 0x113   :  { %v1627_v52 = vpop.f32.mrf.mxu2  ;;  %v1603_v55 = vpop.f32.mrf.mxu0 }
 0x114   :  { %v1640_v54 = vpop.f32.mrf.mxu3  ;;  %2087 = vmatmul.bf16.vlgmr.msrb.gmra.mxu1 %v1805_v51  ;;  %v1616_v56 = vpop.f32.mrf.mxu1  ;;  %v1628_v6 = vadd.f32 %v1627_v52, %v285_v2 }
 0x116   :  { %v1641_v34 = vadd.f32 %v1640_v54, %v1628_v6 }
 0x11b   :  { %v1629_v22 = vpop.f32.mrf.mxu2 }
 0x11c   :  { %v1642_v60 = vpop.f32.mrf.mxu3 }
 0x12b   :  { %v1653_v19 = vpop.f32.mrf.mxu0 }
 0x12c   :  { %v1666_v0 = vpop.f32.mrf.mxu1  ;;  %v1654_v13 = vadd.f32 %v1653_v19, %v1641_v34 }
 0x12e   :  { %v1667_v20 = vadd.f32 %v1666_v0, %v1654_v13 }
 0x133   :  { %v1679_v3 = vpop.f32.mrf.mxu2  ;;  %v1655_v7 = vpop.f32.mrf.mxu0 }
 0x134   :  { %v1692_v4 = vpop.f32.mrf.mxu3  ;;  %v1668_v8 = vpop.f32.mrf.mxu1  ;;  %v1680_v14 = vadd.f32 %v1679_v3, %v1667_v20 }
 0x136   :  { %v1693_v41 = vadd.f32 %v1692_v4, %v1680_v14 }
 0x13b   :  { %v1681_v10 = vpop.f32.mrf.mxu2 }
 0x13c   :  { %v1694_v12 = vpop.f32.mrf.mxu3 }
 0x14b   :  { %v1705_v15 = vpop.f32.mrf.mxu0 }
 0x14c   :  { %v1706_v17 = vadd.f32 %v1705_v15, %v1693_v41  ;;  %v1718_v58 = vpop.f32.mrf.mxu1 }
 0x14d   :  { %v1719_v32 = vadd.f32 %v1718_v58, %v286_v31 }
 0x14e   :  { %v1802_v21 = vmax.f32 %v1706_v17, 0.0 }
 0x150   :  { %v1806_v23 = vpack.c.bf16 %v1802_v21, %v1802_v21 }
 0x152   :  { %2100 = vmatmul.bf16.vlgmr.msrb.gmra.mxu2 %v1806_v23 }
 0x153   :  { %v1731_v25 = vpop.f32.mrf.mxu2  ;;  %v1707_v26 = vpop.f32.mrf.mxu0 }
 0x154   :  { %v1744_v63 = vpop.f32.mrf.mxu3  ;;  %v1720_v29 = vpop.f32.mrf.mxu1  ;;  %v1732_v33 = vadd.f32 %v1731_v25, %v1719_v32 }
 0x156   :  { %v1745_v35 = vadd.f32 %v1744_v63, %v1732_v33 }
 0x15b   :  { %v1733_v61 = vpop.f32.mrf.mxu2 }
 0x15c   :  { %v1746_v30 = vpop.f32.mrf.mxu3 }
 0x16b   :  { %v1757_v36 = vpop.f32.mrf.mxu0 }
 0x16c   :  { %v1770_v62 = vpop.f32.mrf.mxu1  ;;  %v1758_v38 = vadd.f32 %v1757_v36, %v1745_v35 }
 0x16e   :  { %v1771_v39 = vadd.f32 %v1770_v62, %v1758_v38 }
 0x173   :  { %v1783_v27 = vpop.f32.mrf.mxu2  ;;  %v1759_v16 = vpop.f32.mrf.mxu0 }
 0x174   :  { %v1784_v42 = vadd.f32 %v1783_v27, %v1771_v39  ;;  %v1796_v44 = vpop.f32.mrf.mxu3  ;;  %v1772_v45 = vpop.f32.mrf.mxu1 }
 0x176   :  { %v1797_v46 = vadd.f32 %v1796_v44, %v1784_v42 }
 0x178   :  { %v1803_v48 = vmax.f32 %v1797_v46, 0.0 }
 0x17a   :  { %v1807_v49 = vpack.c.bf16 %v1803_v48, %v1803_v48 }
 0x17b   :  { %v1785_v50 = vpop.f32.mrf.mxu2 }
 0x17c   :  { %v1798_v51 = vpop.f32.mrf.mxu3  ;;  %2113 = vmatmul.bf16.vlgmr.msrb.gmra.mxu3 %v1807_v49 }
 0x18b   :  { %v2075_v52 = vpop.f32.mrf.mxu0 }
 0x18c   :  { %v2076_v54 = vadd.f32 %v3424_v53, %v2075_v52 }
 0x191   :  { %v2088_v55 = vpop.f32.mrf.mxu1 }
 0x192   :  { %v2089_v56 = vadd.f32 %v2088_v55, %v2076_v54 }
 0x193   :  { %v2077_v47 = vpop.f32.mrf.mxu0 }
 0x199   :  { %v2090_v57 = vpop.f32.mrf.mxu1 }
 0x1d5   :  { %v2101_v22 = vpop.f32.mrf.mxu2 }
 0x1d6   :  { %v2102_v60 = vadd.f32 %v2101_v22, %v2089_v56 }
 0x1dd   :  { %v2103_v59 = vpop.f32.mrf.mxu2 }
 0x1ff   :  { %v2114_v18 = vpop.f32.mrf.mxu3 }
 0x200   :  { %v2115_v19 = vadd.f32 %v2114_v18, %v2102_v60 }
 0x202   :  { %2118 = vst [vmem:[#allocation7] sm:$0xff] %v2115_v19 }
 0x203   :  { %2129 = dma.vmem_to_hbm [thread:$0]  %s2125_s16, 128, %s2127_s19, [#allocation4]  }
 0x207   :  { %v2116_v0 = vpop.f32.mrf.mxu3 }
 0x208   :  { %3501 = dma.done.wait [#allocation4], 128  }
 0x209   :  { %3502 = vsyncadd [#allocation4], 4294967168 }
 0x20a   :  { %2134 = vsyncpa [#allocation3], 1 }
 0x20b   :  { %2135 = vsyncpa [#allocation6], 1 }
 0x20c   :  { %2136 = vsyncpa [#allocation4], 1 }

</bundles_post_ra>
